<compile_context>
chip_gen: v7x
topology: tpu7x:2x2x1
jax: 0.10.0
libtpu: 0.0.40
codegen_flags: <defaults>
</compile_context>

<pallas_src>
import functools

import jax
import jax.numpy as jnp
from jax import lax
from jax.experimental import pallas as pl
from jax.experimental.pallas import tpu as pltpu

EMBED = 64        # TaskHead embed_dim
N_HEADS = 4       # num_pulses, pulse_width, time_delay, repetition_interval
N_CLASSES = 5     # classifier output width
OUT_W = 128       # lane-dense packed output width (cols 0:5 softmax, 5:9 rad, rest unused)
INV_SQRT2 = 0.7071067811865476
SQRT_2_OVER_PI = 0.7978845608028654
GELU_CUBIC = 0.044715


def _gelu_tanh(v):
  # tanh-approx GELU: transcendental goes to the EUP slot instead of an erf VPU polynomial.
  # Max abs deviation from PyTorch's exact erf GELU is ~1e-3, well inside the accuracy budget.
  return 0.5 * v * (1.0 + jnp.tanh(SQRT_2_OVER_PI * (v + GELU_CUBIC * v * v * v)))


def placeholder_mlp_kernel(
    x_ref,
    w1_ref, b1_ref, w2_ref, b2_ref, w3_ref, b3_ref, w4_ref, b4_ref,
    wf_ref, bf_ref,
    out_ref):
  bf16 = jnp.bfloat16
  # ---- shared MLP: 1024 -> 512 -> 256 -> 128 -> 64; bf16 MXU operands, f32 accumulation ----
  h = _gelu_tanh(jnp.dot(x_ref[...], w1_ref[...],
                         preferred_element_type=jnp.float32) + b1_ref[...]).astype(bf16)
  h = _gelu_tanh(jnp.dot(h, w2_ref[...],
                         preferred_element_type=jnp.float32) + b2_ref[...]).astype(bf16)
  h = _gelu_tanh(jnp.dot(h, w3_ref[...],
                         preferred_element_type=jnp.float32) + b3_ref[...]).astype(bf16)
  h = _gelu_tanh(jnp.dot(h, w4_ref[...],
                         preferred_element_type=jnp.float32) + b4_ref[...]).astype(bf16)  # (TB, 64)

  # ---- fused heads + classifier: one (TB,64)@(64,128) matmul into a lane-dense slab ----
  pre = jnp.dot(h, wf_ref[...], preferred_element_type=jnp.float32) + bf_ref[...]  # (TB, 128)

  # softmax over the classifier lanes only (cols 0:5); rad lanes (5:9) pass through unchanged.
  lane = lax.broadcasted_iota(jnp.int32, pre.shape, 1)
  is_logit = lane < N_CLASSES
  masked = jnp.where(is_logit, pre, -1e30)
  m = jnp.max(masked, axis=1, keepdims=True)
  e = jnp.exp(masked - m)
  denom = jnp.sum(e, axis=1, keepdims=True)
  probs = e * pl.reciprocal(denom, approx=True)        # EUP reciprocal, not a VALU divide
  out_ref[...] = jnp.where(is_logit, probs, pre)


def _round_up(n, m):
  return ((n + m - 1) // m) * m


def _fold_heads(conv_w, conv_b, lin_w, lin_b):
  """Fold circular Conv1d(1->C, k=3) + Linear(C*C, 1) of every head into V (P, H) and bias (1, H).

  rad_head[b] = sum_{c,p} L[c,p] * (w_k0[c]*h[b,p-1] + w_k1[c]*h[b,p] + w_k2[c]*h[b,p+1] + cb[c]) + lb
              = h[b,:] @ V[:, head] + bias[head]          (indices mod 64, circular)
  """
  w_k0 = conv_w[:, 0, :, 0]       # (H, C)  tap multiplying h[p-1]
  w_k1 = conv_w[:, 1, :, 0]       # (H, C)  tap multiplying h[p]
  w_k2 = conv_w[:, 2, :, 0]       # (H, C)  tap multiplying h[p+1]
  L = lin_w                       # (H, C, P)
  V = (jnp.einsum('hc,hcp->ph', w_k1, L)
       + jnp.einsum('hc,hcp->ph', w_k0, jnp.roll(L, -1, axis=2))
       + jnp.einsum('hc,hcp->ph', w_k2, jnp.roll(L, 1, axis=2)))        # (P, H)
  bias = jnp.einsum('hc,hc->h', conv_b[:, :, 0], jnp.sum(L, axis=2))[None, :] + lin_b  # (1, H)
  return V, bias


@functools.partial(jax.jit, static_argnames=("tb",))
def placeholder_mlp(x, params, *, tb=512):
  (w1, b1, w2, b2, w3, b3, w4, b4, conv_w, conv_b, lin_w, lin_b, wc, bc) = params
  batch = x.shape[0]
  bf16 = jnp.bfloat16

  # Cast straight to bf16 (no f32 padded intermediate).
  x_bf = x.reshape(batch, 1024).astype(bf16)

  # Fold TaskHeads and fuse them with the classifier into one lane-dense (64, 128) matrix.
  v_mat, rad_bias = _fold_heads(conv_w, conv_b, lin_w, lin_b)
  w_fused = (jnp.zeros((EMBED, OUT_W), jnp.float32)
             .at[:, 0:N_CLASSES].set(wc)
             .at[:, N_CLASSES:N_CLASSES + N_HEADS].set(v_mat))
  b_fused = (jnp.zeros((1, OUT_W), jnp.float32)
             .at[:, 0:N_CLASSES].set(bc)
             .at[:, N_CLASSES:N_CLASSES + N_HEADS].set(rad_bias))

  # Batch tiling: sublane-aligned tile; keep >=2 grid steps when possible (v7x has 2 TensorCores).
  padded8 = _round_up(batch, 8)
  tile = min(tb, padded8)
  if tile == padded8 and padded8 >= 16:
    tile = _round_up(padded8 // 2, 8)
  padded = _round_up(batch, tile)
  if padded != batch:
    x_bf = jnp.pad(x_bf, ((0, padded - batch), (0, 0)))

  weight_args = (w1.astype(bf16), b1, w2.astype(bf16), b2, w3.astype(bf16), b3,
                 w4.astype(bf16), b4, w_fused.astype(bf16), b_fused)

  def const_spec(a):   # weights/biases stay VMEM-resident across all grid steps
    return pl.BlockSpec(a.shape, lambda i: (0, 0))

  grid = (pl.cdiv(padded, tile),)
  slab = pl.pallas_call(
      placeholder_mlp_kernel,
      out_shape=jax.ShapeDtypeStruct((padded, OUT_W), jnp.float32),
      grid_spec=pltpu.PrefetchScalarGridSpec(
          num_scalar_prefetch=0,
          grid=grid,
          in_specs=[pl.BlockSpec((tile, 1024), lambda i: (i, 0))]
                   + [const_spec(a) for a in weight_args],
          out_specs=pl.BlockSpec((tile, OUT_W), lambda i: (i, 0))),
      compiler_params=pltpu.CompilerParams(
          dimension_semantics=("parallel",),
          vmem_limit_bytes=32 * 1024 * 1024),
  )(x_bf, *weight_args)

  p_type = slab[:batch, 0:N_CLASSES]
  rad = slab[:batch, N_CLASSES:N_CLASSES + N_HEADS]
  return p_type, rad


def init_params(key):
  ks = jax.random.split(key, 14)

  def lin(kw, kb, fan_in, fan_out, scale=0.05):
    w = scale * jax.random.normal(kw, (fan_in, fan_out), jnp.float32)
    b = scale * jax.random.normal(kb, (1, fan_out), jnp.float32)
    return w, b

  w1, b1 = lin(ks[0], ks[1], 1024, 512)
  w2, b2 = lin(ks[2], ks[3], 512, 256)
  w3, b3 = lin(ks[4], ks[5], 256, 128)
  w4, b4 = lin(ks[6], ks[7], 128, 64)
  # TaskHead params stacked over the 4 heads.
  conv_w = 0.1 * jax.random.normal(ks[8], (N_HEADS, 3, EMBED, 1), jnp.float32)
  conv_b = 0.1 * jax.random.normal(ks[9], (N_HEADS, EMBED, 1), jnp.float32)
  lin_w = 0.02 * jax.random.normal(ks[10], (N_HEADS, EMBED, EMBED), jnp.float32)
  lin_b = 0.02 * jax.random.normal(ks[11], (1, N_HEADS), jnp.float32)
  wc, bc = lin(ks[12], ks[13], 64, 5, scale=0.1)
  return (w1, b1, w2, b2, w3, b3, w4, b4, conv_w, conv_b, lin_w, lin_b, wc, bc)


def reference_forward(x, params):
  # Pure-JAX f32 reference that mirrors the PyTorch module structure (exact erf GELU, unfused heads).
  (w1, b1, w2, b2, w3, b3, w4, b4, conv_w, conv_b, lin_w, lin_b, wc, bc) = params

  def gelu(v):
    return 0.5 * v * (1.0 + lax.erf(v * INV_SQRT2))

  h = gelu(x @ w1 + b1)
  h = gelu(h @ w2 + b2)
  h = gelu(h @ w3 + b3)
  h = gelu(h @ w4 + b4)
  hp = jnp.roll(h, 1, axis=1)[:, None, :]
  hc = h[:, None, :]
  hn = jnp.roll(h, -1, axis=1)[:, None, :]
  rads = []
  for head in range(N_HEADS):
    conv = (conv_w[head, 0][None] * hp + conv_w[head, 1][None] * hc
            + conv_w[head, 2][None] * hn + conv_b[head][None])
    rads.append(jnp.sum(conv * lin_w[head][None], axis=(1, 2))[:, None]
                + lin_b[:, head:head + 1])
  rad = jnp.concatenate(rads, axis=1)
  logits = h @ wc + bc
  return jax.nn.softmax(logits, axis=1), rad


if __name__ == "__main__":
  key = jax.random.PRNGKey(0)
  pkey, xkey = jax.random.split(key)
  params = init_params(pkey)

  batch = 2
  x = jax.random.normal(xkey, (batch, 1024), jnp.float32)

  p_type, rad_params = placeholder_mlp(x, params)
  jax.block_until_ready((p_type, rad_params))

  assert p_type.shape == (batch, 5)
  assert rad_params.shape == (batch, 4)

  ref_p, ref_rad = reference_forward(x.reshape(batch, 1024), params)
  assert jnp.allclose(p_type, ref_p, rtol=5e-2, atol=1e-2)
  assert jnp.allclose(rad_params, ref_rad, rtol=5e-2, atol=1e-2)

  print("KERNEL_OK")
</pallas_src>

<mosaic_0001>
module attributes {stable_mosaic.version = 11 : i64} {
  func.func @placeholder_mlp_kernel(%arg0: i32, %arg1: memref<8x1024xbf16, #tpu.memory_space<vmem>>, %arg2: memref<1024x512xbf16, #tpu.memory_space<vmem>>, %arg3: memref<1x512xf32, #tpu.memory_space<vmem>>, %arg4: memref<512x256xbf16, #tpu.memory_space<vmem>>, %arg5: memref<1x256xf32, #tpu.memory_space<vmem>>, %arg6: memref<256x128xbf16, #tpu.memory_space<vmem>>, %arg7: memref<1x128xf32, #tpu.memory_space<vmem>>, %arg8: memref<128x64xbf16, #tpu.memory_space<vmem>>, %arg9: memref<1x64xf32, #tpu.memory_space<vmem>>, %arg10: memref<64x128xbf16, #tpu.memory_space<vmem>>, %arg11: memref<1x128xf32, #tpu.memory_space<vmem>>, %arg12: memref<8x128xf32, #tpu.memory_space<vmem>>) attributes {dimension_semantics = [#tpu.dimension_semantics<parallel>], iteration_bounds = array<i64: 1>, scalar_prefetch = 0 : i64, scratch_operands = 0 : i64, tpu.core_type = #tpu.core_type<tc>, window_params = [{transform_indices = @transform_0, window_bounds = array<i64: 8, 1024>}, {pipeline_mode = #tpu.pipeline_mode<synchronous>, transform_indices = @transform_1, window_bounds = array<i64: 1024, 512>}, {pipeline_mode = #tpu.pipeline_mode<synchronous>, transform_indices = @transform_2, window_bounds = array<i64: 1, 512>}, {pipeline_mode = #tpu.pipeline_mode<synchronous>, transform_indices = @transform_3, window_bounds = array<i64: 512, 256>}, {pipeline_mode = #tpu.pipeline_mode<synchronous>, transform_indices = @transform_4, window_bounds = array<i64: 1, 256>}, {pipeline_mode = #tpu.pipeline_mode<synchronous>, transform_indices = @transform_5, window_bounds = array<i64: 256, 128>}, {pipeline_mode = #tpu.pipeline_mode<synchronous>, transform_indices = @transform_6, window_bounds = array<i64: 1, 128>}, {pipeline_mode = #tpu.pipeline_mode<synchronous>, transform_indices = @transform_7, window_bounds = array<i64: 128, 64>}, {pipeline_mode = #tpu.pipeline_mode<synchronous>, transform_indices = @transform_8, window_bounds = array<i64: 1, 64>}, {pipeline_mode = #tpu.pipeline_mode<synchronous>, transform_indices = @transform_9, window_bounds = array<i64: 64, 128>}, {pipeline_mode = #tpu.pipeline_mode<synchronous>, transform_indices = @transform_10, window_bounds = array<i64: 1, 128>}, {transform_indices = @transform_11, window_bounds = array<i64: 8, 128>}]} {
    %c0 = arith.constant 0 : index
    %c0_0 = arith.constant 0 : index
    %0 = vector.load %arg1[%c0, %c0_0] : memref<8x1024xbf16, #tpu.memory_space<vmem>>, vector<8x1024xbf16>
    %c0_1 = arith.constant 0 : index
    %c0_2 = arith.constant 0 : index
    %1 = vector.load %arg2[%c0_1, %c0_2] : memref<1024x512xbf16, #tpu.memory_space<vmem>>, vector<1024x512xbf16>
    %cst = arith.constant dense<0.000000e+00> : vector<8x512xf32>
    %2 = tpu.matmul %0, %1, %cst {dimension_numbers = #tpu.dot_dimension_numbers<[1], [0], [0], [1], [0, 0, 1, 1], [], []>} : vector<8x1024xbf16>, vector<1024x512xbf16>, vector<8x512xf32> -> vector<8x512xf32>
    %c0_3 = arith.constant 0 : index
    %c0_4 = arith.constant 0 : index
    %3 = vector.load %arg3[%c0_3, %c0_4] : memref<1x512xf32, #tpu.memory_space<vmem>>, vector<1x512xf32>
    %4 = vector.broadcast %3 : vector<1x512xf32> to vector<8x512xf32>
    %5 = arith.addf %2, %4 : vector<8x512xf32>
    %cst_5 = arith.constant 5.000000e-01 : f32
    %6 = vector.broadcast %cst_5 : f32 to vector<8x512xf32>
    %7 = arith.mulf %6, %5 : vector<8x512xf32>
    %cst_6 = arith.constant 4.471500e-02 : f32
    %8 = vector.broadcast %cst_6 : f32 to vector<8x512xf32>
    %9 = arith.mulf %8, %5 : vector<8x512xf32>
    %10 = arith.mulf %9, %5 : vector<8x512xf32>
    %11 = arith.mulf %10, %5 : vector<8x512xf32>
    %12 = arith.addf %5, %11 : vector<8x512xf32>
    %cst_7 = arith.constant 0.797884583 : f32
    %13 = vector.broadcast %cst_7 : f32 to vector<8x512xf32>
    %14 = arith.mulf %13, %12 : vector<8x512xf32>
    %15 = math.tanh %14 : vector<8x512xf32>
    %cst_8 = arith.constant 1.000000e+00 : f32
    %16 = vector.broadcast %cst_8 : f32 to vector<8x512xf32>
    %17 = arith.addf %16, %15 : vector<8x512xf32>
    %18 = arith.mulf %7, %17 : vector<8x512xf32>
    %19 = arith.truncf %18 : vector<8x512xf32> to vector<8x512xbf16>
    %c0_9 = arith.constant 0 : index
    %c0_10 = arith.constant 0 : index
    %20 = vector.load %arg4[%c0_9, %c0_10] : memref<512x256xbf16, #tpu.memory_space<vmem>>, vector<512x256xbf16>
    %cst_11 = arith.constant dense<0.000000e+00> : vector<8x256xf32>
    %21 = tpu.matmul %19, %20, %cst_11 {dimension_numbers = #tpu.dot_dimension_numbers<[1], [0], [0], [1], [0, 0, 1, 1], [], []>} : vector<8x512xbf16>, vector<512x256xbf16>, vector<8x256xf32> -> vector<8x256xf32>
    %c0_12 = arith.constant 0 : index
    %c0_13 = arith.constant 0 : index
    %22 = vector.load %arg5[%c0_12, %c0_13] : memref<1x256xf32, #tpu.memory_space<vmem>>, vector<1x256xf32>
    %23 = vector.broadcast %22 : vector<1x256xf32> to vector<8x256xf32>
    %24 = arith.addf %21, %23 : vector<8x256xf32>
    %cst_14 = arith.constant 5.000000e-01 : f32
    %25 = vector.broadcast %cst_14 : f32 to vector<8x256xf32>
    %26 = arith.mulf %25, %24 : vector<8x256xf32>
    %cst_15 = arith.constant 4.471500e-02 : f32
    %27 = vector.broadcast %cst_15 : f32 to vector<8x256xf32>
    %28 = arith.mulf %27, %24 : vector<8x256xf32>
    %29 = arith.mulf %28, %24 : vector<8x256xf32>
    %30 = arith.mulf %29, %24 : vector<8x256xf32>
    %31 = arith.addf %24, %30 : vector<8x256xf32>
    %cst_16 = arith.constant 0.797884583 : f32
    %32 = vector.broadcast %cst_16 : f32 to vector<8x256xf32>
    %33 = arith.mulf %32, %31 : vector<8x256xf32>
    %34 = math.tanh %33 : vector<8x256xf32>
    %cst_17 = arith.constant 1.000000e+00 : f32
    %35 = vector.broadcast %cst_17 : f32 to vector<8x256xf32>
    %36 = arith.addf %35, %34 : vector<8x256xf32>
    %37 = arith.mulf %26, %36 : vector<8x256xf32>
    %38 = arith.truncf %37 : vector<8x256xf32> to vector<8x256xbf16>
    %c0_18 = arith.constant 0 : index
    %c0_19 = arith.constant 0 : index
    %39 = vector.load %arg6[%c0_18, %c0_19] : memref<256x128xbf16, #tpu.memory_space<vmem>>, vector<256x128xbf16>
    %cst_20 = arith.constant dense<0.000000e+00> : vector<8x128xf32>
    %40 = tpu.matmul %38, %39, %cst_20 {dimension_numbers = #tpu.dot_dimension_numbers<[1], [0], [0], [1], [0, 0, 1, 1], [], []>} : vector<8x256xbf16>, vector<256x128xbf16>, vector<8x128xf32> -> vector<8x128xf32>
    %c0_21 = arith.constant 0 : index
    %c0_22 = arith.constant 0 : index
    %41 = vector.load %arg7[%c0_21, %c0_22] : memref<1x128xf32, #tpu.memory_space<vmem>>, vector<1x128xf32>
    %42 = vector.broadcast %41 : vector<1x128xf32> to vector<8x128xf32>
    %43 = arith.addf %40, %42 : vector<8x128xf32>
    %cst_23 = arith.constant 5.000000e-01 : f32
    %44 = vector.broadcast %cst_23 : f32 to vector<8x128xf32>
    %45 = arith.mulf %44, %43 : vector<8x128xf32>
    %cst_24 = arith.constant 4.471500e-02 : f32
    %46 = vector.broadcast %cst_24 : f32 to vector<8x128xf32>
    %47 = arith.mulf %46, %43 : vector<8x128xf32>
    %48 = arith.mulf %47, %43 : vector<8x128xf32>
    %49 = arith.mulf %48, %43 : vector<8x128xf32>
    %50 = arith.addf %43, %49 : vector<8x128xf32>
    %cst_25 = arith.constant 0.797884583 : f32
    %51 = vector.broadcast %cst_25 : f32 to vector<8x128xf32>
    %52 = arith.mulf %51, %50 : vector<8x128xf32>
    %53 = math.tanh %52 : vector<8x128xf32>
    %cst_26 = arith.constant 1.000000e+00 : f32
    %54 = vector.broadcast %cst_26 : f32 to vector<8x128xf32>
    %55 = arith.addf %54, %53 : vector<8x128xf32>
    %56 = arith.mulf %45, %55 : vector<8x128xf32>
    %57 = arith.truncf %56 : vector<8x128xf32> to vector<8x128xbf16>
    %c0_27 = arith.constant 0 : index
    %c0_28 = arith.constant 0 : index
    %58 = vector.load %arg8[%c0_27, %c0_28] : memref<128x64xbf16, #tpu.memory_space<vmem>>, vector<128x64xbf16>
    %cst_29 = arith.constant dense<0.000000e+00> : vector<8x64xf32>
    %59 = tpu.matmul %57, %58, %cst_29 {dimension_numbers = #tpu.dot_dimension_numbers<[1], [0], [0], [1], [0, 0, 1, 1], [], []>} : vector<8x128xbf16>, vector<128x64xbf16>, vector<8x64xf32> -> vector<8x64xf32>
    %c0_30 = arith.constant 0 : index
    %c0_31 = arith.constant 0 : index
    %60 = vector.load %arg9[%c0_30, %c0_31] : memref<1x64xf32, #tpu.memory_space<vmem>>, vector<1x64xf32>
    %61 = vector.broadcast %60 : vector<1x64xf32> to vector<8x64xf32>
    %62 = arith.addf %59, %61 : vector<8x64xf32>
    %cst_32 = arith.constant 5.000000e-01 : f32
    %63 = vector.broadcast %cst_32 : f32 to vector<8x64xf32>
    %64 = arith.mulf %63, %62 : vector<8x64xf32>
    %cst_33 = arith.constant 4.471500e-02 : f32
    %65 = vector.broadcast %cst_33 : f32 to vector<8x64xf32>
    %66 = arith.mulf %65, %62 : vector<8x64xf32>
    %67 = arith.mulf %66, %62 : vector<8x64xf32>
    %68 = arith.mulf %67, %62 : vector<8x64xf32>
    %69 = arith.addf %62, %68 : vector<8x64xf32>
    %cst_34 = arith.constant 0.797884583 : f32
    %70 = vector.broadcast %cst_34 : f32 to vector<8x64xf32>
    %71 = arith.mulf %70, %69 : vector<8x64xf32>
    %72 = math.tanh %71 : vector<8x64xf32>
    %cst_35 = arith.constant 1.000000e+00 : f32
    %73 = vector.broadcast %cst_35 : f32 to vector<8x64xf32>
    %74 = arith.addf %73, %72 : vector<8x64xf32>
    %75 = arith.mulf %64, %74 : vector<8x64xf32>
    %76 = arith.truncf %75 : vector<8x64xf32> to vector<8x64xbf16>
    %c0_36 = arith.constant 0 : index
    %c0_37 = arith.constant 0 : index
    %77 = vector.load %arg10[%c0_36, %c0_37] : memref<64x128xbf16, #tpu.memory_space<vmem>>, vector<64x128xbf16>
    %cst_38 = arith.constant dense<0.000000e+00> : vector<8x128xf32>
    %78 = tpu.matmul %76, %77, %cst_38 {dimension_numbers = #tpu.dot_dimension_numbers<[1], [0], [0], [1], [0, 0, 1, 1], [], []>} : vector<8x64xbf16>, vector<64x128xbf16>, vector<8x128xf32> -> vector<8x128xf32>
    %c0_39 = arith.constant 0 : index
    %c0_40 = arith.constant 0 : index
    %79 = vector.load %arg11[%c0_39, %c0_40] : memref<1x128xf32, #tpu.memory_space<vmem>>, vector<1x128xf32>
    %80 = vector.broadcast %79 : vector<1x128xf32> to vector<8x128xf32>
    %81 = arith.addf %78, %80 : vector<8x128xf32>
    %82 = tpu.iota {dimensions = array<i32: 1>} : vector<8x128xi32>
    %c5_i32 = arith.constant 5 : i32
    %83 = vector.broadcast %c5_i32 : i32 to vector<8x128xi32>
    %84 = arith.cmpi slt, %82, %83 : vector<8x128xi32>
    %cst_41 = arith.constant -1.000000e+30 : f32
    %85 = vector.broadcast %cst_41 : f32 to vector<8x128xf32>
    %86 = arith.select %84, %81, %85 : vector<8x128xi1>, vector<8x128xf32>
    %cst_42 = arith.constant dense<0xFF800000> : vector<8xf32>
    %87 = vector.multi_reduction <maximumf>, %86, %cst_42 [1] : vector<8x128xf32> to vector<8xf32>
    %88 = vector.shape_cast %87 : vector<8xf32> to vector<8x1xf32>
    %89 = vector.broadcast %88 : vector<8x1xf32> to vector<8x128xf32>
    %90 = arith.subf %86, %89 : vector<8x128xf32>
    %91 = math.exp %90 : vector<8x128xf32>
    %cst_43 = arith.constant dense<0.000000e+00> : vector<8xf32>
    %92 = vector.multi_reduction <add>, %91, %cst_43 [1] : vector<8x128xf32> to vector<8xf32>
    %93 = vector.shape_cast %92 : vector<8xf32> to vector<8x1xf32>
    %94 = tpu.reciprocal %93 {approx = true} : vector<8x1xf32> -> vector<8x1xf32>
    %95 = vector.broadcast %94 : vector<8x1xf32> to vector<8x128xf32>
    %96 = arith.mulf %91, %95 : vector<8x128xf32>
    %97 = arith.select %84, %96, %81 : vector<8x128xi1>, vector<8x128xf32>
    %c0_44 = arith.constant 0 : index
    %c0_45 = arith.constant 0 : index
    %98 = vector.load %arg12[%c0_44, %c0_45] : memref<8x128xf32, #tpu.memory_space<vmem>>, vector<8x128xf32>
    tpu.vector_store %arg12[%c0_44, %c0_45], %97 {strides = array<i32>} : memref<8x128xf32, #tpu.memory_space<vmem>>, vector<8x128xf32>,
    return
  }
  func.func @transform_0(%arg0: i32) -> (i32, i32) {
    %c0_i32 = arith.constant 0 : i32
    %c0_i32_0 = arith.constant 0 : i32
    return %arg0, %c0_i32 : i32, i32
  }
  func.func @transform_1(%arg0: i32) -> (i32, i32) {
    %c0_i32 = arith.constant 0 : i32
    %c0_i32_0 = arith.constant 0 : i32
    %c0_i32_1 = arith.constant 0 : i32
    return %c0_i32, %c0_i32_0 : i32, i32
  }
  func.func @transform_2(%arg0: i32) -> (i32, i32) {
    %c0_i32 = arith.constant 0 : i32
    %c0_i32_0 = arith.constant 0 : i32
    %c0_i32_1 = arith.constant 0 : i32
    return %c0_i32, %c0_i32_0 : i32, i32
  }
  func.func @transform_3(%arg0: i32) -> (i32, i32) {
    %c0_i32 = arith.constant 0 : i32
    %c0_i32_0 = arith.constant 0 : i32
    %c0_i32_1 = arith.constant 0 : i32
    return %c0_i32, %c0_i32_0 : i32, i32
  }
  func.func @transform_4(%arg0: i32) -> (i32, i32) {
    %c0_i32 = arith.constant 0 : i32
    %c0_i32_0 = arith.constant 0 : i32
    %c0_i32_1 = arith.constant 0 : i32
    return %c0_i32, %c0_i32_0 : i32, i32
  }
  func.func @transform_5(%arg0: i32) -> (i32, i32) {
    %c0_i32 = arith.constant 0 : i32
    %c0_i32_0 = arith.constant 0 : i32
    %c0_i32_1 = arith.constant 0 : i32
    return %c0_i32, %c0_i32_0 : i32, i32
  }
  func.func @transform_6(%arg0: i32) -> (i32, i32) {
    %c0_i32 = arith.constant 0 : i32
    %c0_i32_0 = arith.constant 0 : i32
    %c0_i32_1 = arith.constant 0 : i32
    return %c0_i32, %c0_i32_0 : i32, i32
  }
  func.func @transform_7(%arg0: i32) -> (i32, i32) {
    %c0_i32 = arith.constant 0 : i32
    %c0_i32_0 = arith.constant 0 : i32
    %c0_i32_1 = arith.constant 0 : i32
    return %c0_i32, %c0_i32_0 : i32, i32
  }
  func.func @transform_8(%arg0: i32) -> (i32, i32) {
    %c0_i32 = arith.constant 0 : i32
    %c0_i32_0 = arith.constant 0 : i32
    %c0_i32_1 = arith.constant 0 : i32
    return %c0_i32, %c0_i32_0 : i32, i32
  }
  func.func @transform_9(%arg0: i32) -> (i32, i32) {
    %c0_i32 = arith.constant 0 : i32
    %c0_i32_0 = arith.constant 0 : i32
    %c0_i32_1 = arith.constant 0 : i32
    return %c0_i32, %c0_i32_0 : i32, i32
  }
  func.func @transform_10(%arg0: i32) -> (i32, i32) {
    %c0_i32 = arith.constant 0 : i32
    %c0_i32_0 = arith.constant 0 : i32
    %c0_i32_1 = arith.constant 0 : i32
    return %c0_i32, %c0_i32_0 : i32, i32
  }
  func.func @transform_11(%arg0: i32) -> (i32, i32) {
    %c0_i32 = arith.constant 0 : i32
    %c0_i32_0 = arith.constant 0 : i32
    return %arg0, %c0_i32 : i32, i32
  }
}

</mosaic_0001>

<bundles_post_ra>
// kernel: placeholder_mlp.1
= control target key start
LH: loop header
LB: loop body
LE: loop exit
PB: predicated region body
PF: predicated region fallthrough
CT: control target
= control target key end

     0   :  { %vm3904_vm0 = vmmov 0   ;;  %vm2840_vm1 = vcmask 523264   ;;  %s5086_s1 = inlined_call_operand.vmem [shape: bf16[1024,512], index: 1, kind: input, shape index: {}]   ;;  %s5087_s0 = inlined_call_operand.vmem [shape: bf16[8,1024], index: 0, kind: input, shape index: {}]   ;;  %s5088_s3 = inlined_call_operand.vmem [shape: bf16[512,256], index: 3, kind: input, shape index: {}]   ;;  %s5089_s2 = inlined_call_operand.vmem [shape: f32[1,512], index: 2, kind: input, shape index: {}]   ;;  %s5090_s5 = inlined_call_operand.vmem [shape: bf16[256,128], index: 5, kind: input, shape index: {}]   ;;  %s5091_s4 = inlined_call_operand.vmem [shape: f32[1,256], index: 4, kind: input, shape index: {}]   ;;  %s5092_s7 = inlined_call_operand.vmem [shape: bf16[128,64], index: 7, kind: input, shape index: {}]   ;;  %s5093_s6 = inlined_call_operand.vmem [shape: f32[1,128], index: 6, kind: input, shape index: {}]   ;;  %s5094_s9 = inlined_call_operand.vmem [shape: bf16[64,128], index: 9, kind: input, shape index: {}]   ;;  %s5095_s8 = inlined_call_operand.vmem [shape: f32[1,64], index: 8, kind: input, shape index: {}]   ;;  %s5096_s10 = inlined_call_operand.vmem [shape: f32[1,128], index: 10, kind: input, shape index: {}]   ;;  %s5097_s11 = inlined_call_operand.vmem [shape: f32[8,128], index: 11, kind: output, shape index: {}]  }
   0x1   :  { %v3367_v0 = vld [vmem:[%s5086_s1 + $0x4] ss:$16 sps:$4 sm:$0xff]   ;;  %v3369_v1 = vld [vmem:[%s5086_s1 + $0xc] ss:$16 sps:$4 sm:$0xff]   ;;  %v3371_v2 = vld [vmem:[%s5086_s1] ss:$16 sps:$4 sm:$0xff]  }
   0x2   :  { %1629 = vmatprep.subr.bf16.mxu0 %v3367_v0  ;;  %v3372_v3 = vld [vmem:[%s5086_s1 + $0x8] ss:$16 sps:$4 sm:$0xff]   ;;  %1793 = vmatprep.subr.bf16.mxu1 %v3369_v1  ;;  %v3373_v4 = vld [vmem:[%s5086_s1 + $0x24] ss:$16 sps:$4 sm:$0xff]   ;;  %v3375_v5 = vld [vmem:[%s5086_s1 + $0x2c] ss:$16 sps:$4 sm:$0xff]  }
   0x3   :  { %1630 = vmatpush1.bf16.msra.mxu0 %v3371_v2  ;;  %1794 = vmatpush1.bf16.msra.mxu1 %v3372_v3  ;;  %v3377_v6 = vld [vmem:[%s5086_s1 + $0x20] ss:$16 sps:$4 sm:$0xff]   ;;  %v3378_v7 = vld [vmem:[%s5086_s1 + $0x28] ss:$16 sps:$4 sm:$0xff]   ;;  %v3379_v8 = vld [vmem:[%s5086_s1 + $0x44] ss:$16 sps:$4 sm:$0xff]  }
   0x4   :  { %1631 = vmatprep.subr.bf16.mxu0 %v3373_v4  ;;  %1795 = vmatprep.subr.bf16.mxu1 %v3375_v5  ;;  %v3381_v9 = vld [vmem:[%s5086_s1 + $0x4c] ss:$16 sps:$4 sm:$0xff]   ;;  %v3383_v10 = vld [vmem:[%s5086_s1 + $0x40] ss:$16 sps:$4 sm:$0xff]   ;;  %v3384_v11 = vld [vmem:[%s5086_s1 + $0x48] ss:$16 sps:$4 sm:$0xff]  }
   0x5   :  { %v3385_v12 = vld [vmem:[%s5086_s1 + $0x64] ss:$16 sps:$4 sm:$0xff]   ;;  %v3387_v13 = vld [vmem:[%s5086_s1 + $0x6c] ss:$16 sps:$4 sm:$0xff]   ;;  %v3389_v14 = vld [vmem:[%s5086_s1 + $0x60] ss:$16 sps:$4 sm:$0xff]  }
   0x6   :  { %v3390_v15 = vld [vmem:[%s5086_s1 + $0x68] ss:$16 sps:$4 sm:$0xff]   ;;  %v3391_v16 = vld [vmem:[%s5086_s1 + $0x84] ss:$16 sps:$4 sm:$0xff]   ;;  %v3393_v17 = vld [vmem:[%s5086_s1 + $0x8c] ss:$16 sps:$4 sm:$0xff]  }
   0x7   :  { %1632 = vmatpush1.bf16.msra.mxu0 %v3377_v6  ;;  %1796 = vmatpush1.bf16.msra.mxu1 %v3378_v7  ;;  %v3395_v18 = vld [vmem:[%s5086_s1 + $0x80] ss:$16 sps:$4 sm:$0xff]   ;;  %v3396_v19 = vld [vmem:[%s5086_s1 + $0x88] ss:$16 sps:$4 sm:$0xff]   ;;  %v3397_v20 = vld [vmem:[%s5086_s1 + $0xa4] ss:$16 sps:$4 sm:$0xff]  }
   0x8   :  { %1633 = vmatprep.subr.bf16.mxu0 %v3379_v8  ;;  %1797 = vmatprep.subr.bf16.mxu1 %v3381_v9  ;;  %v3399_v21 = vld [vmem:[%s5086_s1 + $0xac] ss:$16 sps:$4 sm:$0xff]   ;;  %v3401_v22 = vld [vmem:[%s5086_s1 + $0xa0] ss:$16 sps:$4 sm:$0xff]   ;;  %v3402_v23 = vld [vmem:[%s5086_s1 + $0xa8] ss:$16 sps:$4 sm:$0xff]  }
   0x9   :  { %v3403_v24 = vld [vmem:[%s5086_s1 + $0xc4] ss:$16 sps:$4 sm:$0xff]   ;;  %v3405_v25 = vld [vmem:[%s5086_s1 + $0xcc] ss:$16 sps:$4 sm:$0xff]   ;;  %v3407_v26 = vld [vmem:[%s5086_s1 + $0xc0] ss:$16 sps:$4 sm:$0xff]  }
   0xa   :  { %v3408_v27 = vld [vmem:[%s5086_s1 + $0xc8] ss:$16 sps:$4 sm:$0xff]   ;;  %v3409_v28 = vld [vmem:[%s5086_s1 + $0xe4] ss:$16 sps:$4 sm:$0xff]   ;;  %v3411_v29 = vld [vmem:[%s5086_s1 + $0xec] ss:$16 sps:$4 sm:$0xff]  }
   0xb   :  { %1634 = vmatpush1.bf16.msra.mxu0 %v3383_v10  ;;  %1798 = vmatpush1.bf16.msra.mxu1 %v3384_v11  ;;  %v3413_v30 = vld [vmem:[%s5086_s1 + $0xe0] ss:$16 sps:$4 sm:$0xff]   ;;  %v3414_v31 = vld [vmem:[%s5086_s1 + $0xe8] ss:$16 sps:$4 sm:$0xff]   ;;  %v3415_v32 = vld [vmem:[%s5086_s1 + $0x104] ss:$16 sps:$4 sm:$0xff]  }
   0xc   :  { %1635 = vmatprep.subr.bf16.mxu0 %v3385_v12  ;;  %1799 = vmatprep.subr.bf16.mxu1 %v3387_v13  ;;  %v3417_v33 = vld [vmem:[%s5086_s1 + $0x10c] ss:$16 sps:$4 sm:$0xff]   ;;  %v3419_v34 = vld [vmem:[%s5086_s1 + $0x100] ss:$16 sps:$4 sm:$0xff]   ;;  %v3420_v35 = vld [vmem:[%s5086_s1 + $0x108] ss:$16 sps:$4 sm:$0xff]  }
   0xd   :  { %v3421_v36 = vld [vmem:[%s5086_s1 + $0x124] ss:$16 sps:$4 sm:$0xff]   ;;  %v3423_v37 = vld [vmem:[%s5086_s1 + $0x12c] ss:$16 sps:$4 sm:$0xff]   ;;  %v3425_v38 = vld [vmem:[%s5086_s1 + $0x120] ss:$16 sps:$4 sm:$0xff]  }
   0xe   :  { %v3426_v39 = vld [vmem:[%s5086_s1 + $0x128] ss:$16 sps:$4 sm:$0xff]   ;;  %v3427_v40 = vld [vmem:[%s5086_s1 + $0x144] ss:$16 sps:$4 sm:$0xff]   ;;  %v3429_v41 = vld [vmem:[%s5086_s1 + $0x14c] ss:$16 sps:$4 sm:$0xff]  }
   0xf   :  { %1636 = vmatpush1.bf16.msra.mxu0 %v3389_v14  ;;  %1800 = vmatpush1.bf16.msra.mxu1 %v3390_v15  ;;  %v3431_v42 = vld [vmem:[%s5086_s1 + $0x140] ss:$16 sps:$4 sm:$0xff]   ;;  %v3432_v43 = vld [vmem:[%s5086_s1 + $0x148] ss:$16 sps:$4 sm:$0xff]   ;;  %v3433_v44 = vld [vmem:[%s5086_s1 + $0x164] ss:$16 sps:$4 sm:$0xff]  }
  0x10   :  { %1637 = vmatprep.subr.bf16.mxu0 %v3391_v16  ;;  %1801 = vmatprep.subr.bf16.mxu1 %v3393_v17  ;;  %v3435_v45 = vld [vmem:[%s5086_s1 + $0x16c] ss:$16 sps:$4 sm:$0xff]   ;;  %v39_v46 = vld [vmem:[%s5087_s0] sm:$0xff]  ;;  %v3438_v49 = vld [vmem:[%s5086_s1 + $0x168] ss:$16 sps:$4 sm:$0xff]  }
  0x11   :  { %v3437_v47 = vld [vmem:[%s5086_s1 + $0x160] ss:$16 sps:$4 sm:$0xff]   ;;  %v2904_v48 = vcombine.high %v39_v46, %v39_v46  ;;  %v3439_v50 = vld [vmem:[%s5086_s1 + $0x184] ss:$16 sps:$4 sm:$0xff]   ;;  %v3441_v51 = vld [vmem:[%s5086_s1 + $0x18c] ss:$16 sps:$4 sm:$0xff]   ;;  %v2903_v4 = vcombine.low %v39_v46, %v39_v46 }
  0x12   :  { %v3443_v52 = vld [vmem:[%s5086_s1 + $0x180] ss:$16 sps:$4 sm:$0xff]   ;;  %v3444_v53 = vld [vmem:[%s5086_s1 + $0x188] ss:$16 sps:$4 sm:$0xff]   ;;  %v3445_v54 = vld [vmem:[%s5086_s1 + $0x1a4] ss:$16 sps:$4 sm:$0xff]  }
  0x13   :  { %1638 = vmatpush1.bf16.msra.mxu0 %v3395_v18  ;;  %1802 = vmatpush1.bf16.msra.mxu1 %v3396_v19  ;;  %v3447_v55 = vld [vmem:[%s5086_s1 + $0x1ac] ss:$16 sps:$4 sm:$0xff]   ;;  %v3449_v56 = vld [vmem:[%s5086_s1 + $0x1a0] ss:$16 sps:$4 sm:$0xff]   ;;  %v3450_v57 = vld [vmem:[%s5086_s1 + $0x1a8] ss:$16 sps:$4 sm:$0xff]  }
  0x14   :  { %1639 = vmatprep.subr.bf16.mxu0 %v3397_v20  ;;  %1803 = vmatprep.subr.bf16.mxu1 %v3399_v21  ;;  %v3451_v58 = vld [vmem:[%s5086_s1 + $0x1c4] ss:$16 sps:$4 sm:$0xff]   ;;  %v3453_v59 = vld [vmem:[%s5086_s1 + $0x1cc] ss:$16 sps:$4 sm:$0xff]   ;;  %v3455_v60 = vld [vmem:[%s5086_s1 + $0x1c0] ss:$16 sps:$4 sm:$0xff]  }
  0x15   :  { %1661 = vmatprep.mubr.bf16.mxu0 %v2904_v48  ;;  %1825 = vmatprep.mubr.bf16.mxu1 %v2904_v48  ;;  %v3456_v61 = vld [vmem:[%s5086_s1 + $0x1c8] ss:$16 sps:$4 sm:$0xff]   ;;  %v3457_v62 = vld [vmem:[%s5086_s1 + $0x1e4] ss:$16 sps:$4 sm:$0xff]   ;;  %v3459_v63 = vld [vmem:[%s5086_s1 + $0x1ec] ss:$16 sps:$4 sm:$0xff]  }
  0x16   :  { %v3461_v0 = vld [vmem:[%s5086_s1 + $0x1e0] ss:$16 sps:$4 sm:$0xff]   ;;  %v3462_v1 = vld [vmem:[%s5086_s1 + $0x1e8] ss:$16 sps:$4 sm:$0xff]   ;;  %v3467_v2 = vld [vmem:[%s5086_s1 + $0x204] ss:$16 sps:$4 sm:$0xff]  }
  0x17   :  { %1640 = vmatpush1.bf16.msra.mxu0 %v3401_v22  ;;  %1804 = vmatpush1.bf16.msra.mxu1 %v3402_v23  ;;  %v3470_v3 = vld [vmem:[%s5086_s1 + $0x20c] ss:$16 sps:$4 sm:$0xff]   ;;  %v3465_v5 = vld [vmem:[%s5086_s1 + $0x200] ss:$16 sps:$4 sm:$0xff]   ;;  %v3468_v6 = vld [vmem:[%s5086_s1 + $0x208] ss:$16 sps:$4 sm:$0xff]  }
  0x18   :  { %1641 = vmatprep.subr.bf16.mxu0 %v3403_v24  ;;  %1805 = vmatprep.subr.bf16.mxu1 %v3405_v25  ;;  %v3473_v7 = vld [vmem:[%s5086_s1 + $0x224] ss:$16 sps:$4 sm:$0xff]   ;;  %v3476_v8 = vld [vmem:[%s5086_s1 + $0x22c] ss:$16 sps:$4 sm:$0xff]   ;;  %v3471_v9 = vld [vmem:[%s5086_s1 + $0x220] ss:$16 sps:$4 sm:$0xff]  }
  0x19   :  { %v3474_v10 = vld [vmem:[%s5086_s1 + $0x228] ss:$16 sps:$4 sm:$0xff]   ;;  %v3479_v11 = vld [vmem:[%s5086_s1 + $0x244] ss:$16 sps:$4 sm:$0xff]   ;;  %v3482_v12 = vld [vmem:[%s5086_s1 + $0x24c] ss:$16 sps:$4 sm:$0xff]  }
  0x1a   :  { %v3477_v13 = vld [vmem:[%s5086_s1 + $0x240] ss:$16 sps:$4 sm:$0xff]   ;;  %v3480_v14 = vld [vmem:[%s5086_s1 + $0x248] ss:$16 sps:$4 sm:$0xff]   ;;  %v3485_v15 = vld [vmem:[%s5086_s1 + $0x264] ss:$16 sps:$4 sm:$0xff]  }
  0x1b   :  { %1642 = vmatpush1.bf16.msra.mxu0 %v3407_v26  ;;  %1806 = vmatpush1.bf16.msra.mxu1 %v3408_v27  ;;  %v3488_v16 = vld [vmem:[%s5086_s1 + $0x26c] ss:$16 sps:$4 sm:$0xff]   ;;  %v3483_v17 = vld [vmem:[%s5086_s1 + $0x260] ss:$16 sps:$4 sm:$0xff]   ;;  %v3486_v18 = vld [vmem:[%s5086_s1 + $0x268] ss:$16 sps:$4 sm:$0xff]  }
  0x1c   :  { %1643 = vmatprep.subr.bf16.mxu0 %v3409_v28  ;;  %1807 = vmatprep.subr.bf16.mxu1 %v3411_v29  ;;  %v3491_v19 = vld [vmem:[%s5086_s1 + $0x284] ss:$16 sps:$4 sm:$0xff]   ;;  %v3494_v20 = vld [vmem:[%s5086_s1 + $0x28c] ss:$16 sps:$4 sm:$0xff]   ;;  %v3489_v21 = vld [vmem:[%s5086_s1 + $0x280] ss:$16 sps:$4 sm:$0xff]  }
  0x1d   :  { %v3492_v22 = vld [vmem:[%s5086_s1 + $0x288] ss:$16 sps:$4 sm:$0xff]   ;;  %v3497_v23 = vld [vmem:[%s5086_s1 + $0x2a4] ss:$16 sps:$4 sm:$0xff]   ;;  %v3500_v24 = vld [vmem:[%s5086_s1 + $0x2ac] ss:$16 sps:$4 sm:$0xff]  }
  0x1e   :  { %v3495_v25 = vld [vmem:[%s5086_s1 + $0x2a0] ss:$16 sps:$4 sm:$0xff]   ;;  %v3498_v26 = vld [vmem:[%s5086_s1 + $0x2a8] ss:$16 sps:$4 sm:$0xff]   ;;  %v3503_v27 = vld [vmem:[%s5086_s1 + $0x2c4] ss:$16 sps:$4 sm:$0xff]  }
  0x1f   :  { %1644 = vmatpush1.bf16.msra.mxu0 %v3413_v30  ;;  %1808 = vmatpush1.bf16.msra.mxu1 %v3414_v31  ;;  %v3506_v28 = vld [vmem:[%s5086_s1 + $0x2cc] ss:$16 sps:$4 sm:$0xff]   ;;  %v3501_v31 = vld [vmem:[%s5086_s1 + $0x2c0] ss:$16 sps:$4 sm:$0xff]   ;;  %v3528_v48 = vld [vmem:[%s5086_s1 + $0x348] ss:$16 sps:$4 sm:$0xff]  }
  0x20   :  { %1645 = vmatprep.subr.bf16.mxu0 %v3415_v32  ;;  %1809 = vmatprep.subr.bf16.mxu1 %v3417_v33  ;;  %v4241_v29 = vld [vmem:[%s5087_s0 + $0x8] sm:$0xff]  ;;  %v3509_v33 = vld [vmem:[%s5086_s1 + $0x2e4] ss:$16 sps:$4 sm:$0xff]  }
  0x21   :  { %v2906_v30 = vcombine.high %v4241_v29, %v4241_v29  ;;  %v3504_v32 = vld [vmem:[%s5086_s1 + $0x2c8] ss:$16 sps:$4 sm:$0xff]   ;;  %v3530_v46 = vld [vmem:[%s5086_s1 + $0x34c] ss:$16 sps:$4 sm:$0xff]  }
  0x23   :  { %1646 = vmatpush1.bf16.msra.mxu0 %v3419_v34  ;;  %1810 = vmatpush1.bf16.msra.mxu1 %v3420_v35  ;;  %v3512_v34 = vld [vmem:[%s5086_s1 + $0x2ec] ss:$16 sps:$4 sm:$0xff]   ;;  %v3507_v35 = vld [vmem:[%s5086_s1 + $0x2e0] ss:$16 sps:$4 sm:$0xff]  }
  0x24   :  { %1647 = vmatprep.subr.bf16.mxu0 %v3421_v36  ;;  %1811 = vmatprep.subr.bf16.mxu1 %v3423_v37  ;;  %v3510_v36 = vld [vmem:[%s5086_s1 + $0x2e8] ss:$16 sps:$4 sm:$0xff]   ;;  %v3515_v37 = vld [vmem:[%s5086_s1 + $0x304] ss:$16 sps:$4 sm:$0xff]  }
  0x27   :  { %1648 = vmatpush1.bf16.msra.mxu0 %v3425_v38  ;;  %1812 = vmatpush1.bf16.msra.mxu1 %v3426_v39  ;;  %v3518_v38 = vld [vmem:[%s5086_s1 + $0x30c] ss:$16 sps:$4 sm:$0xff]   ;;  %v3513_v39 = vld [vmem:[%s5086_s1 + $0x300] ss:$16 sps:$4 sm:$0xff]  }
  0x28   :  { %1649 = vmatprep.subr.bf16.mxu0 %v3427_v40  ;;  %1813 = vmatprep.subr.bf16.mxu1 %v3429_v41  ;;  %v3516_v40 = vld [vmem:[%s5086_s1 + $0x308] ss:$16 sps:$4 sm:$0xff]   ;;  %v3521_v41 = vld [vmem:[%s5086_s1 + $0x324] ss:$16 sps:$4 sm:$0xff]  }
  0x2b   :  { %1650 = vmatpush1.bf16.msra.mxu0 %v3431_v42  ;;  %1814 = vmatpush1.bf16.msra.mxu1 %v3432_v43  ;;  %v3524_v42 = vld [vmem:[%s5086_s1 + $0x32c] ss:$16 sps:$4 sm:$0xff]   ;;  %v3519_v43 = vld [vmem:[%s5086_s1 + $0x320] ss:$16 sps:$4 sm:$0xff]  }
  0x2c   :  { %1651 = vmatprep.subr.bf16.mxu0 %v3433_v44  ;;  %1815 = vmatprep.subr.bf16.mxu1 %v3435_v45  ;;  %v3522_v44 = vld [vmem:[%s5086_s1 + $0x328] ss:$16 sps:$4 sm:$0xff]   ;;  %v3527_v45 = vld [vmem:[%s5086_s1 + $0x344] ss:$16 sps:$4 sm:$0xff]  }
  0x2f   :  { %1652 = vmatpush1.bf16.msra.mxu0 %v3437_v47  ;;  %1816 = vmatpush1.bf16.msra.mxu1 %v3438_v49  ;;  %v3525_v47 = vld [vmem:[%s5086_s1 + $0x340] ss:$16 sps:$4 sm:$0xff]   ;;  %v3533_v49 = vld [vmem:[%s5086_s1 + $0x364] ss:$16 sps:$4 sm:$0xff]  }
  0x30   :  { %1653 = vmatprep.subr.bf16.mxu0 %v3439_v50  ;;  %1817 = vmatprep.subr.bf16.mxu1 %v3441_v51  ;;  %v3536_v50 = vld [vmem:[%s5086_s1 + $0x36c] ss:$16 sps:$4 sm:$0xff]   ;;  %v3531_v51 = vld [vmem:[%s5086_s1 + $0x360] ss:$16 sps:$4 sm:$0xff]  }
  0x33   :  { %1654 = vmatpush1.bf16.msra.mxu0 %v3443_v52  ;;  %1818 = vmatpush1.bf16.msra.mxu1 %v3444_v53  ;;  %v3534_v52 = vld [vmem:[%s5086_s1 + $0x368] ss:$16 sps:$4 sm:$0xff]   ;;  %v3539_v53 = vld [vmem:[%s5086_s1 + $0x384] ss:$16 sps:$4 sm:$0xff]  }
  0x34   :  { %1655 = vmatprep.subr.bf16.mxu0 %v3445_v54  ;;  %1819 = vmatprep.subr.bf16.mxu1 %v3447_v55  ;;  %v3542_v54 = vld [vmem:[%s5086_s1 + $0x38c] ss:$16 sps:$4 sm:$0xff]   ;;  %v3537_v55 = vld [vmem:[%s5086_s1 + $0x380] ss:$16 sps:$4 sm:$0xff]  }
  0x37   :  { %1656 = vmatpush1.bf16.msra.mxu0 %v3449_v56  ;;  %1820 = vmatpush1.bf16.msra.mxu1 %v3450_v57  ;;  %v3540_v56 = vld [vmem:[%s5086_s1 + $0x388] ss:$16 sps:$4 sm:$0xff]   ;;  %v3545_v57 = vld [vmem:[%s5086_s1 + $0x3a4] ss:$16 sps:$4 sm:$0xff]  }
  0x38   :  { %1657 = vmatprep.subr.bf16.mxu0 %v3451_v58  ;;  %1821 = vmatprep.subr.bf16.mxu1 %v3453_v59  ;;  %v3548_v58 = vld [vmem:[%s5086_s1 + $0x3ac] ss:$16 sps:$4 sm:$0xff]   ;;  %v3543_v59 = vld [vmem:[%s5086_s1 + $0x3a0] ss:$16 sps:$4 sm:$0xff]  }
  0x3b   :  { %1658 = vmatpush1.bf16.msra.mxu0 %v3455_v60  ;;  %1822 = vmatpush1.bf16.msra.mxu1 %v3456_v61  ;;  %v3546_v60 = vld [vmem:[%s5086_s1 + $0x3a8] ss:$16 sps:$4 sm:$0xff]   ;;  %v3551_v61 = vld [vmem:[%s5086_s1 + $0x3c4] ss:$16 sps:$4 sm:$0xff]  }
  0x3c   :  { %1659 = vmatprep.subr.bf16.mxu0 %v3457_v62  ;;  %1823 = vmatprep.subr.bf16.mxu1 %v3459_v63  ;;  %v3554_v62 = vld [vmem:[%s5086_s1 + $0x3cc] ss:$16 sps:$4 sm:$0xff]   ;;  %v3549_v63 = vld [vmem:[%s5086_s1 + $0x3c0] ss:$16 sps:$4 sm:$0xff]  }
  0x3f   :  { %1660 = vmatpush1.bf16.msra.mxu0 %v3461_v0  ;;  %1824 = vmatpush1.bf16.msra.mxu1 %v3462_v1  ;;  %v3552_v0 = vld [vmem:[%s5086_s1 + $0x3c8] ss:$16 sps:$4 sm:$0xff]   ;;  %v3557_v1 = vld [vmem:[%s5086_s1 + $0x3e4] ss:$16 sps:$4 sm:$0xff]  }
  0x40   :  { %1670 = vmatprep.subr.bf16.mxu0 %v3467_v2  ;;  %1834 = vmatprep.subr.bf16.mxu1 %v3470_v3  ;;  %v3560_v2 = vld [vmem:[%s5086_s1 + $0x3ec] ss:$16 sps:$4 sm:$0xff]   ;;  %v3555_v3 = vld [vmem:[%s5086_s1 + $0x3e0] ss:$16 sps:$4 sm:$0xff]  }
  0x42   :  { %1662 = vmatmul.mubr.bf16.vlgmr.msra.gmra.mrb[0].mxu0 %v2903_v4  ;;  %1826 = vmatmul.mubr.bf16.vlgmr.msra.gmra.mrb[0].mxu1 %v2903_v4  ;;  %v3558_v4 = vld [vmem:[%s5086_s1 + $0x3e8] ss:$16 sps:$4 sm:$0xff]  }
  0x43   :  { %1671 = vmatpush1.bf16.msra.mxu0 %v3465_v5  ;;  %1835 = vmatpush1.bf16.msra.mxu1 %v3468_v6  ;;  %v3565_v5 = vld [vmem:[%s5086_s1 + $0x404] ss:$16 sps:$4 sm:$0xff]   ;;  %v3568_v6 = vld [vmem:[%s5086_s1 + $0x40c] ss:$16 sps:$4 sm:$0xff]  }
  0x44   :  { %1672 = vmatprep.subr.bf16.mxu0 %v3473_v7  ;;  %1836 = vmatprep.subr.bf16.mxu1 %v3476_v8  ;;  %v2905_v7 = vcombine.low %v4241_v29, %v4241_v29  ;;  %v3563_v8 = vld [vmem:[%s5086_s1 + $0x400] ss:$16 sps:$4 sm:$0xff]   ;;  %v3598_v29 = vld [vmem:[%s5086_s1 + $0x4ac] ss:$16 sps:$4 sm:$0xff]  }
  0x45   :  { %1702 = vmatprep.mubr.bf16.mxu0 %v2906_v30  ;;  %1866 = vmatprep.mubr.bf16.mxu1 %v2906_v30  ;;  %v3593_v30 = vld [vmem:[%s5086_s1 + $0x4a0] ss:$16 sps:$4 sm:$0xff]  }
  0x47   :  { %1673 = vmatpush1.bf16.msra.mxu0 %v3471_v9  ;;  %1837 = vmatpush1.bf16.msra.mxu1 %v3474_v10  ;;  %v3566_v9 = vld [vmem:[%s5086_s1 + $0x408] ss:$16 sps:$4 sm:$0xff]   ;;  %v3571_v10 = vld [vmem:[%s5086_s1 + $0x424] ss:$16 sps:$4 sm:$0xff]  }
  0x48   :  { %1674 = vmatprep.subr.bf16.mxu0 %v3479_v11  ;;  %1838 = vmatprep.subr.bf16.mxu1 %v3482_v12  ;;  %v4379_v11 = vld [vmem:[%s5087_s0 + $0x10] sm:$0xff]  ;;  %v3574_v12 = vld [vmem:[%s5086_s1 + $0x42c] ss:$16 sps:$4 sm:$0xff]  }
  0x4b   :  { %1675 = vmatpush1.bf16.msra.mxu0 %v3477_v13  ;;  %1839 = vmatpush1.bf16.msra.mxu1 %v3480_v14  ;;  %v2908_v13 = vcombine.high %v4379_v11, %v4379_v11  ;;  %v3569_v14 = vld [vmem:[%s5086_s1 + $0x420] ss:$16 sps:$4 sm:$0xff]  }
  0x4c   :  { %1676 = vmatprep.subr.bf16.mxu0 %v3485_v15  ;;  %1840 = vmatprep.subr.bf16.mxu1 %v3488_v16  ;;  %v3572_v15 = vld [vmem:[%s5086_s1 + $0x428] ss:$16 sps:$4 sm:$0xff]   ;;  %v3577_v16 = vld [vmem:[%s5086_s1 + $0x444] ss:$16 sps:$4 sm:$0xff]  }
  0x4f   :  { %1677 = vmatpush1.bf16.msra.mxu0 %v3483_v17  ;;  %1841 = vmatpush1.bf16.msra.mxu1 %v3486_v18  ;;  %v3580_v17 = vld [vmem:[%s5086_s1 + $0x44c] ss:$16 sps:$4 sm:$0xff]   ;;  %v3575_v18 = vld [vmem:[%s5086_s1 + $0x440] ss:$16 sps:$4 sm:$0xff]  }
  0x50   :  { %1678 = vmatprep.subr.bf16.mxu0 %v3491_v19  ;;  %1842 = vmatprep.subr.bf16.mxu1 %v3494_v20  ;;  %v3578_v19 = vld [vmem:[%s5086_s1 + $0x448] ss:$16 sps:$4 sm:$0xff]   ;;  %v3583_v20 = vld [vmem:[%s5086_s1 + $0x464] ss:$16 sps:$4 sm:$0xff]  }
  0x53   :  { %1679 = vmatpush1.bf16.msra.mxu0 %v3489_v21  ;;  %1843 = vmatpush1.bf16.msra.mxu1 %v3492_v22  ;;  %v3586_v21 = vld [vmem:[%s5086_s1 + $0x46c] ss:$16 sps:$4 sm:$0xff]   ;;  %v3581_v22 = vld [vmem:[%s5086_s1 + $0x460] ss:$16 sps:$4 sm:$0xff]  }
  0x54   :  { %1680 = vmatprep.subr.bf16.mxu0 %v3497_v23  ;;  %1844 = vmatprep.subr.bf16.mxu1 %v3500_v24  ;;  %v3584_v23 = vld [vmem:[%s5086_s1 + $0x468] ss:$16 sps:$4 sm:$0xff]   ;;  %v3589_v24 = vld [vmem:[%s5086_s1 + $0x484] ss:$16 sps:$4 sm:$0xff]  }
  0x57   :  { %1681 = vmatpush1.bf16.msra.mxu0 %v3495_v25  ;;  %1845 = vmatpush1.bf16.msra.mxu1 %v3498_v26  ;;  %v3592_v25 = vld [vmem:[%s5086_s1 + $0x48c] ss:$16 sps:$4 sm:$0xff]   ;;  %v3587_v26 = vld [vmem:[%s5086_s1 + $0x480] ss:$16 sps:$4 sm:$0xff]  }
  0x58   :  { %1682 = vmatprep.subr.bf16.mxu0 %v3503_v27  ;;  %1846 = vmatprep.subr.bf16.mxu1 %v3506_v28  ;;  %v3590_v27 = vld [vmem:[%s5086_s1 + $0x488] ss:$16 sps:$4 sm:$0xff]   ;;  %v3595_v28 = vld [vmem:[%s5086_s1 + $0x4a4] ss:$16 sps:$4 sm:$0xff]  }
  0x5b   :  { %1683 = vmatpush1.bf16.msra.mxu0 %v3501_v31  ;;  %1847 = vmatpush1.bf16.msra.mxu1 %v3504_v32  ;;  %v3596_v31 = vld [vmem:[%s5086_s1 + $0x4a8] ss:$16 sps:$4 sm:$0xff]   ;;  %v3601_v32 = vld [vmem:[%s5086_s1 + $0x4c4] ss:$16 sps:$4 sm:$0xff]  }
  0x5c   :  { %1684 = vmatprep.subr.bf16.mxu0 %v3509_v33  ;;  %1848 = vmatprep.subr.bf16.mxu1 %v3512_v34  ;;  %v3604_v33 = vld [vmem:[%s5086_s1 + $0x4cc] ss:$16 sps:$4 sm:$0xff]   ;;  %v3599_v34 = vld [vmem:[%s5086_s1 + $0x4c0] ss:$16 sps:$4 sm:$0xff]  }
  0x5f   :  { %1685 = vmatpush1.bf16.msra.mxu0 %v3507_v35  ;;  %1849 = vmatpush1.bf16.msra.mxu1 %v3510_v36  ;;  %v3602_v35 = vld [vmem:[%s5086_s1 + $0x4c8] ss:$16 sps:$4 sm:$0xff]   ;;  %v3607_v36 = vld [vmem:[%s5086_s1 + $0x4e4] ss:$16 sps:$4 sm:$0xff]  }
  0x60   :  { %1686 = vmatprep.subr.bf16.mxu0 %v3515_v37  ;;  %1850 = vmatprep.subr.bf16.mxu1 %v3518_v38  ;;  %v3610_v37 = vld [vmem:[%s5086_s1 + $0x4ec] ss:$16 sps:$4 sm:$0xff]   ;;  %v3605_v38 = vld [vmem:[%s5086_s1 + $0x4e0] ss:$16 sps:$4 sm:$0xff]  }
  0x63   :  { %1687 = vmatpush1.bf16.msra.mxu0 %v3513_v39  ;;  %1851 = vmatpush1.bf16.msra.mxu1 %v3516_v40  ;;  %v3608_v39 = vld [vmem:[%s5086_s1 + $0x4e8] ss:$16 sps:$4 sm:$0xff]   ;;  %v3613_v40 = vld [vmem:[%s5086_s1 + $0x504] ss:$16 sps:$4 sm:$0xff]  }
  0x64   :  { %1688 = vmatprep.subr.bf16.mxu0 %v3521_v41  ;;  %1852 = vmatprep.subr.bf16.mxu1 %v3524_v42  ;;  %v3616_v41 = vld [vmem:[%s5086_s1 + $0x50c] ss:$16 sps:$4 sm:$0xff]   ;;  %v3611_v42 = vld [vmem:[%s5086_s1 + $0x500] ss:$16 sps:$4 sm:$0xff]  }
  0x67   :  { %1689 = vmatpush1.bf16.msra.mxu0 %v3519_v43  ;;  %1853 = vmatpush1.bf16.msra.mxu1 %v3522_v44  ;;  %v3614_v43 = vld [vmem:[%s5086_s1 + $0x508] ss:$16 sps:$4 sm:$0xff]   ;;  %v3619_v44 = vld [vmem:[%s5086_s1 + $0x524] ss:$16 sps:$4 sm:$0xff]  }
  0x68   :  { %1690 = vmatprep.subr.bf16.mxu0 %v3527_v45  ;;  %1854 = vmatprep.subr.bf16.mxu1 %v3530_v46  ;;  %v3622_v45 = vld [vmem:[%s5086_s1 + $0x52c] ss:$16 sps:$4 sm:$0xff]   ;;  %v3617_v46 = vld [vmem:[%s5086_s1 + $0x520] ss:$16 sps:$4 sm:$0xff]  }
  0x6b   :  { %1691 = vmatpush1.bf16.msra.mxu0 %v3525_v47  ;;  %1855 = vmatpush1.bf16.msra.mxu1 %v3528_v48  ;;  %v3620_v47 = vld [vmem:[%s5086_s1 + $0x528] ss:$16 sps:$4 sm:$0xff]   ;;  %v3625_v48 = vld [vmem:[%s5086_s1 + $0x544] ss:$16 sps:$4 sm:$0xff]  }
  0x6c   :  { %1692 = vmatprep.subr.bf16.mxu0 %v3533_v49  ;;  %1856 = vmatprep.subr.bf16.mxu1 %v3536_v50  ;;  %v3628_v49 = vld [vmem:[%s5086_s1 + $0x54c] ss:$16 sps:$4 sm:$0xff]   ;;  %v3623_v50 = vld [vmem:[%s5086_s1 + $0x540] ss:$16 sps:$4 sm:$0xff]  }
  0x6f   :  { %1693 = vmatpush1.bf16.msra.mxu0 %v3531_v51  ;;  %1857 = vmatpush1.bf16.msra.mxu1 %v3534_v52  ;;  %v3626_v51 = vld [vmem:[%s5086_s1 + $0x548] ss:$16 sps:$4 sm:$0xff]   ;;  %v3631_v52 = vld [vmem:[%s5086_s1 + $0x564] ss:$16 sps:$4 sm:$0xff]  }
  0x70   :  { %1694 = vmatprep.subr.bf16.mxu0 %v3539_v53  ;;  %1858 = vmatprep.subr.bf16.mxu1 %v3542_v54  ;;  %v3634_v53 = vld [vmem:[%s5086_s1 + $0x56c] ss:$16 sps:$4 sm:$0xff]   ;;  %v3629_v54 = vld [vmem:[%s5086_s1 + $0x560] ss:$16 sps:$4 sm:$0xff]  }
  0x73   :  { %1695 = vmatpush1.bf16.msra.mxu0 %v3537_v55  ;;  %1859 = vmatpush1.bf16.msra.mxu1 %v3540_v56  ;;  %v3632_v55 = vld [vmem:[%s5086_s1 + $0x568] ss:$16 sps:$4 sm:$0xff]   ;;  %v3637_v56 = vld [vmem:[%s5086_s1 + $0x584] ss:$16 sps:$4 sm:$0xff]  }
  0x74   :  { %1696 = vmatprep.subr.bf16.mxu0 %v3545_v57  ;;  %1860 = vmatprep.subr.bf16.mxu1 %v3548_v58  ;;  %v3640_v57 = vld [vmem:[%s5086_s1 + $0x58c] ss:$16 sps:$4 sm:$0xff]   ;;  %v3635_v58 = vld [vmem:[%s5086_s1 + $0x580] ss:$16 sps:$4 sm:$0xff]  }
  0x77   :  { %1697 = vmatpush1.bf16.msra.mxu0 %v3543_v59  ;;  %1861 = vmatpush1.bf16.msra.mxu1 %v3546_v60  ;;  %v3638_v59 = vld [vmem:[%s5086_s1 + $0x588] ss:$16 sps:$4 sm:$0xff]   ;;  %v3643_v60 = vld [vmem:[%s5086_s1 + $0x5a4] ss:$16 sps:$4 sm:$0xff]  }
  0x78   :  { %1698 = vmatprep.subr.bf16.mxu0 %v3551_v61  ;;  %1862 = vmatprep.subr.bf16.mxu1 %v3554_v62  ;;  %v3646_v61 = vld [vmem:[%s5086_s1 + $0x5ac] ss:$16 sps:$4 sm:$0xff]   ;;  %v3641_v62 = vld [vmem:[%s5086_s1 + $0x5a0] ss:$16 sps:$4 sm:$0xff]  }
  0x7b   :  { %1699 = vmatpush1.bf16.msra.mxu0 %v3549_v63  ;;  %1863 = vmatpush1.bf16.msra.mxu1 %v3552_v0  ;;  %v3644_v63 = vld [vmem:[%s5086_s1 + $0x5a8] ss:$16 sps:$4 sm:$0xff]   ;;  %v3649_v0 = vld [vmem:[%s5086_s1 + $0x5c4] ss:$16 sps:$4 sm:$0xff]  }
  0x7c   :  { %1700 = vmatprep.subr.bf16.mxu0 %v3557_v1  ;;  %1864 = vmatprep.subr.bf16.mxu1 %v3560_v2  ;;  %v3652_v1 = vld [vmem:[%s5086_s1 + $0x5cc] ss:$16 sps:$4 sm:$0xff]   ;;  %v3647_v2 = vld [vmem:[%s5086_s1 + $0x5c0] ss:$16 sps:$4 sm:$0xff]  }
  0x7f   :  { %1701 = vmatpush1.bf16.msra.mxu0 %v3555_v3  ;;  %1865 = vmatpush1.bf16.msra.mxu1 %v3558_v4  ;;  %v3650_v3 = vld [vmem:[%s5086_s1 + $0x5c8] ss:$16 sps:$4 sm:$0xff]   ;;  %v3655_v4 = vld [vmem:[%s5086_s1 + $0x5e4] ss:$16 sps:$4 sm:$0xff]  }
  0x80   :  { %1711 = vmatprep.subr.bf16.mxu0 %v3565_v5  ;;  %1875 = vmatprep.subr.bf16.mxu1 %v3568_v6  ;;  %v3658_v5 = vld [vmem:[%s5086_s1 + $0x5ec] ss:$16 sps:$4 sm:$0xff]   ;;  %v3653_v6 = vld [vmem:[%s5086_s1 + $0x5e0] ss:$16 sps:$4 sm:$0xff]  }
  0x82   :  { %1703 = vmatmul.mubr.bf16.vlgmr.msra.gmra.mrb[0].mxu0 %v2905_v7  ;;  %1867 = vmatmul.mubr.bf16.vlgmr.msra.gmra.mrb[0].mxu1 %v2905_v7  ;;  %v3656_v7 = vld [vmem:[%s5086_s1 + $0x5e8] ss:$16 sps:$4 sm:$0xff]  }
  0x83   :  { %1712 = vmatpush1.bf16.msra.mxu0 %v3563_v8  ;;  %1876 = vmatpush1.bf16.msra.mxu1 %v3566_v9  ;;  %v3663_v8 = vld [vmem:[%s5086_s1 + $0x604] ss:$16 sps:$4 sm:$0xff]   ;;  %v3666_v9 = vld [vmem:[%s5086_s1 + $0x60c] ss:$16 sps:$4 sm:$0xff]  }
  0x84   :  { %1713 = vmatprep.subr.bf16.mxu0 %v3571_v10  ;;  %1877 = vmatprep.subr.bf16.mxu1 %v3574_v12  ;;  %v4569_v10 = vld [vmem:[%s5087_s0 + $0x18] sm:$0xff]  ;;  %v3661_v12 = vld [vmem:[%s5086_s1 + $0x600] ss:$16 sps:$4 sm:$0xff]  }
  0x85   :  { %1743 = vmatprep.mubr.bf16.mxu0 %v2908_v13  ;;  %1907 = vmatprep.mubr.bf16.mxu1 %v2908_v13  ;;  %v3664_v13 = vld [vmem:[%s5086_s1 + $0x608] ss:$16 sps:$4 sm:$0xff]  }
  0x87   :  { %1714 = vmatpush1.bf16.msra.mxu0 %v3569_v14  ;;  %1878 = vmatpush1.bf16.msra.mxu1 %v3572_v15  ;;  %v2907_v14 = vcombine.low %v4379_v11, %v4379_v11  ;;  %v3669_v15 = vld [vmem:[%s5086_s1 + $0x624] ss:$16 sps:$4 sm:$0xff]   ;;  %v3670_v11 = vld [vmem:[%s5086_s1 + $0x628] ss:$16 sps:$4 sm:$0xff]  }
  0x88   :  { %1715 = vmatprep.subr.bf16.mxu0 %v3577_v16  ;;  %1879 = vmatprep.subr.bf16.mxu1 %v3580_v17  ;;  %v3672_v16 = vld [vmem:[%s5086_s1 + $0x62c] ss:$16 sps:$4 sm:$0xff]   ;;  %v3667_v17 = vld [vmem:[%s5086_s1 + $0x620] ss:$16 sps:$4 sm:$0xff]  }
  0x8b   :  { %1716 = vmatpush1.bf16.msra.mxu0 %v3575_v18  ;;  %1880 = vmatpush1.bf16.msra.mxu1 %v3578_v19  ;;  %v2910_v18 = vcombine.high %v4569_v10, %v4569_v10  ;;  %v3675_v19 = vld [vmem:[%s5086_s1 + $0x644] ss:$16 sps:$4 sm:$0xff]  }
  0x8c   :  { %1717 = vmatprep.subr.bf16.mxu0 %v3583_v20  ;;  %1881 = vmatprep.subr.bf16.mxu1 %v3586_v21  ;;  %v3678_v20 = vld [vmem:[%s5086_s1 + $0x64c] ss:$16 sps:$4 sm:$0xff]   ;;  %v3673_v21 = vld [vmem:[%s5086_s1 + $0x640] ss:$16 sps:$4 sm:$0xff]  }
  0x8f   :  { %1718 = vmatpush1.bf16.msra.mxu0 %v3581_v22  ;;  %1882 = vmatpush1.bf16.msra.mxu1 %v3584_v23  ;;  %v3676_v22 = vld [vmem:[%s5086_s1 + $0x648] ss:$16 sps:$4 sm:$0xff]   ;;  %v3681_v23 = vld [vmem:[%s5086_s1 + $0x664] ss:$16 sps:$4 sm:$0xff]  }
  0x90   :  { %1719 = vmatprep.subr.bf16.mxu0 %v3589_v24  ;;  %1883 = vmatprep.subr.bf16.mxu1 %v3592_v25  ;;  %v3684_v24 = vld [vmem:[%s5086_s1 + $0x66c] ss:$16 sps:$4 sm:$0xff]   ;;  %v3679_v25 = vld [vmem:[%s5086_s1 + $0x660] ss:$16 sps:$4 sm:$0xff]  }
  0x93   :  { %1720 = vmatpush1.bf16.msra.mxu0 %v3587_v26  ;;  %1884 = vmatpush1.bf16.msra.mxu1 %v3590_v27  ;;  %v3682_v26 = vld [vmem:[%s5086_s1 + $0x668] ss:$16 sps:$4 sm:$0xff]   ;;  %v3687_v27 = vld [vmem:[%s5086_s1 + $0x684] ss:$16 sps:$4 sm:$0xff]  }
  0x94   :  { %1721 = vmatprep.subr.bf16.mxu0 %v3595_v28  ;;  %1885 = vmatprep.subr.bf16.mxu1 %v3598_v29  ;;  %v3690_v28 = vld [vmem:[%s5086_s1 + $0x68c] ss:$16 sps:$4 sm:$0xff]   ;;  %v3685_v29 = vld [vmem:[%s5086_s1 + $0x680] ss:$16 sps:$4 sm:$0xff]  }
  0x97   :  { %1722 = vmatpush1.bf16.msra.mxu0 %v3593_v30  ;;  %1886 = vmatpush1.bf16.msra.mxu1 %v3596_v31  ;;  %v3688_v30 = vld [vmem:[%s5086_s1 + $0x688] ss:$16 sps:$4 sm:$0xff]   ;;  %v3693_v31 = vld [vmem:[%s5086_s1 + $0x6a4] ss:$16 sps:$4 sm:$0xff]  }
  0x98   :  { %1723 = vmatprep.subr.bf16.mxu0 %v3601_v32  ;;  %1887 = vmatprep.subr.bf16.mxu1 %v3604_v33  ;;  %v3696_v32 = vld [vmem:[%s5086_s1 + $0x6ac] ss:$16 sps:$4 sm:$0xff]   ;;  %v3691_v33 = vld [vmem:[%s5086_s1 + $0x6a0] ss:$16 sps:$4 sm:$0xff]  }
  0x9b   :  { %1724 = vmatpush1.bf16.msra.mxu0 %v3599_v34  ;;  %1888 = vmatpush1.bf16.msra.mxu1 %v3602_v35  ;;  %v3694_v34 = vld [vmem:[%s5086_s1 + $0x6a8] ss:$16 sps:$4 sm:$0xff]   ;;  %v3699_v35 = vld [vmem:[%s5086_s1 + $0x6c4] ss:$16 sps:$4 sm:$0xff]  }
  0x9c   :  { %1725 = vmatprep.subr.bf16.mxu0 %v3607_v36  ;;  %1889 = vmatprep.subr.bf16.mxu1 %v3610_v37  ;;  %v3702_v36 = vld [vmem:[%s5086_s1 + $0x6cc] ss:$16 sps:$4 sm:$0xff]   ;;  %v3697_v37 = vld [vmem:[%s5086_s1 + $0x6c0] ss:$16 sps:$4 sm:$0xff]  }
  0x9f   :  { %1726 = vmatpush1.bf16.msra.mxu0 %v3605_v38  ;;  %1890 = vmatpush1.bf16.msra.mxu1 %v3608_v39  ;;  %v3700_v38 = vld [vmem:[%s5086_s1 + $0x6c8] ss:$16 sps:$4 sm:$0xff]   ;;  %v3705_v39 = vld [vmem:[%s5086_s1 + $0x6e4] ss:$16 sps:$4 sm:$0xff]  }
  0xa0   :  { %1727 = vmatprep.subr.bf16.mxu0 %v3613_v40  ;;  %1891 = vmatprep.subr.bf16.mxu1 %v3616_v41  ;;  %v3708_v40 = vld [vmem:[%s5086_s1 + $0x6ec] ss:$16 sps:$4 sm:$0xff]   ;;  %v3703_v41 = vld [vmem:[%s5086_s1 + $0x6e0] ss:$16 sps:$4 sm:$0xff]  }
  0xa3   :  { %1728 = vmatpush1.bf16.msra.mxu0 %v3611_v42  ;;  %1892 = vmatpush1.bf16.msra.mxu1 %v3614_v43  ;;  %v3706_v42 = vld [vmem:[%s5086_s1 + $0x6e8] ss:$16 sps:$4 sm:$0xff]   ;;  %v3711_v43 = vld [vmem:[%s5086_s1 + $0x704] ss:$16 sps:$4 sm:$0xff]  }
  0xa4   :  { %1729 = vmatprep.subr.bf16.mxu0 %v3619_v44  ;;  %1893 = vmatprep.subr.bf16.mxu1 %v3622_v45  ;;  %v3714_v44 = vld [vmem:[%s5086_s1 + $0x70c] ss:$16 sps:$4 sm:$0xff]   ;;  %v3709_v45 = vld [vmem:[%s5086_s1 + $0x700] ss:$16 sps:$4 sm:$0xff]  }
  0xa7   :  { %1730 = vmatpush1.bf16.msra.mxu0 %v3617_v46  ;;  %1894 = vmatpush1.bf16.msra.mxu1 %v3620_v47  ;;  %v3712_v46 = vld [vmem:[%s5086_s1 + $0x708] ss:$16 sps:$4 sm:$0xff]   ;;  %v3717_v47 = vld [vmem:[%s5086_s1 + $0x724] ss:$16 sps:$4 sm:$0xff]  }
  0xa8   :  { %1731 = vmatprep.subr.bf16.mxu0 %v3625_v48  ;;  %1895 = vmatprep.subr.bf16.mxu1 %v3628_v49  ;;  %v3720_v48 = vld [vmem:[%s5086_s1 + $0x72c] ss:$16 sps:$4 sm:$0xff]   ;;  %v3715_v49 = vld [vmem:[%s5086_s1 + $0x720] ss:$16 sps:$4 sm:$0xff]  }
  0xab   :  { %1732 = vmatpush1.bf16.msra.mxu0 %v3623_v50  ;;  %1896 = vmatpush1.bf16.msra.mxu1 %v3626_v51  ;;  %v3718_v50 = vld [vmem:[%s5086_s1 + $0x728] ss:$16 sps:$4 sm:$0xff]   ;;  %v3723_v51 = vld [vmem:[%s5086_s1 + $0x744] ss:$16 sps:$4 sm:$0xff]  }
  0xac   :  { %1733 = vmatprep.subr.bf16.mxu0 %v3631_v52  ;;  %1897 = vmatprep.subr.bf16.mxu1 %v3634_v53  ;;  %v3726_v52 = vld [vmem:[%s5086_s1 + $0x74c] ss:$16 sps:$4 sm:$0xff]   ;;  %v3721_v53 = vld [vmem:[%s5086_s1 + $0x740] ss:$16 sps:$4 sm:$0xff]  }
  0xaf   :  { %1734 = vmatpush1.bf16.msra.mxu0 %v3629_v54  ;;  %1898 = vmatpush1.bf16.msra.mxu1 %v3632_v55  ;;  %v3724_v54 = vld [vmem:[%s5086_s1 + $0x748] ss:$16 sps:$4 sm:$0xff]   ;;  %v3729_v55 = vld [vmem:[%s5086_s1 + $0x764] ss:$16 sps:$4 sm:$0xff]  }
  0xb0   :  { %1735 = vmatprep.subr.bf16.mxu0 %v3637_v56  ;;  %1899 = vmatprep.subr.bf16.mxu1 %v3640_v57  ;;  %v3732_v56 = vld [vmem:[%s5086_s1 + $0x76c] ss:$16 sps:$4 sm:$0xff]   ;;  %v3727_v57 = vld [vmem:[%s5086_s1 + $0x760] ss:$16 sps:$4 sm:$0xff]  }
  0xb3   :  { %1736 = vmatpush1.bf16.msra.mxu0 %v3635_v58  ;;  %1900 = vmatpush1.bf16.msra.mxu1 %v3638_v59  ;;  %v3730_v58 = vld [vmem:[%s5086_s1 + $0x768] ss:$16 sps:$4 sm:$0xff]   ;;  %v3735_v59 = vld [vmem:[%s5086_s1 + $0x784] ss:$16 sps:$4 sm:$0xff]  }
  0xb4   :  { %1737 = vmatprep.subr.bf16.mxu0 %v3643_v60  ;;  %1901 = vmatprep.subr.bf16.mxu1 %v3646_v61  ;;  %v3738_v60 = vld [vmem:[%s5086_s1 + $0x78c] ss:$16 sps:$4 sm:$0xff]   ;;  %v3733_v61 = vld [vmem:[%s5086_s1 + $0x780] ss:$16 sps:$4 sm:$0xff]  }
  0xb7   :  { %1738 = vmatpush1.bf16.msra.mxu0 %v3641_v62  ;;  %1902 = vmatpush1.bf16.msra.mxu1 %v3644_v63  ;;  %v3736_v62 = vld [vmem:[%s5086_s1 + $0x788] ss:$16 sps:$4 sm:$0xff]   ;;  %v3741_v63 = vld [vmem:[%s5086_s1 + $0x7a4] ss:$16 sps:$4 sm:$0xff]  }
  0xb8   :  { %1739 = vmatprep.subr.bf16.mxu0 %v3649_v0  ;;  %1903 = vmatprep.subr.bf16.mxu1 %v3652_v1  ;;  %v3744_v0 = vld [vmem:[%s5086_s1 + $0x7ac] ss:$16 sps:$4 sm:$0xff]   ;;  %v3739_v1 = vld [vmem:[%s5086_s1 + $0x7a0] ss:$16 sps:$4 sm:$0xff]  }
  0xbb   :  { %1740 = vmatpush1.bf16.msra.mxu0 %v3647_v2  ;;  %1904 = vmatpush1.bf16.msra.mxu1 %v3650_v3  ;;  %v3742_v2 = vld [vmem:[%s5086_s1 + $0x7a8] ss:$16 sps:$4 sm:$0xff]   ;;  %v3747_v3 = vld [vmem:[%s5086_s1 + $0x7c4] ss:$16 sps:$4 sm:$0xff]  }
  0xbc   :  { %1741 = vmatprep.subr.bf16.mxu0 %v3655_v4  ;;  %1905 = vmatprep.subr.bf16.mxu1 %v3658_v5  ;;  %v3750_v4 = vld [vmem:[%s5086_s1 + $0x7cc] ss:$16 sps:$4 sm:$0xff]   ;;  %v3745_v5 = vld [vmem:[%s5086_s1 + $0x7c0] ss:$16 sps:$4 sm:$0xff]  }
  0xbf   :  { %1742 = vmatpush1.bf16.msra.mxu0 %v3653_v6  ;;  %1906 = vmatpush1.bf16.msra.mxu1 %v3656_v7  ;;  %v3748_v6 = vld [vmem:[%s5086_s1 + $0x7c8] ss:$16 sps:$4 sm:$0xff]   ;;  %v3753_v7 = vld [vmem:[%s5086_s1 + $0x7e4] ss:$16 sps:$4 sm:$0xff]  }
  0xc0   :  { %1752 = vmatprep.subr.bf16.mxu0 %v3663_v8  ;;  %1916 = vmatprep.subr.bf16.mxu1 %v3666_v9  ;;  %v3756_v8 = vld [vmem:[%s5086_s1 + $0x7ec] ss:$16 sps:$4 sm:$0xff]   ;;  %v3751_v9 = vld [vmem:[%s5086_s1 + $0x7e0] ss:$16 sps:$4 sm:$0xff]  }
  0xc2   :  { %1744 = vmatmul.mubr.bf16.vlgmr.msra.gmra.mrb[0].mxu0 %v2907_v14  ;;  %1908 = vmatmul.mubr.bf16.vlgmr.msra.gmra.mrb[0].mxu1 %v2907_v14  ;;  %v2909_v14 = vcombine.low %v4569_v10, %v4569_v10  ;;  %v3767_v10 = vld [vmem:[%s5088_s3 + $0x24] ss:$8 sps:$4 sm:$0xff]  }
  0xc3   :  { %1753 = vmatpush1.bf16.msra.mxu0 %v3661_v12  ;;  %1917 = vmatpush1.bf16.msra.mxu1 %v3664_v13  ;;  %v3754_v12 = vld [vmem:[%s5086_s1 + $0x7e8] ss:$16 sps:$4 sm:$0xff]   ;;  %v3761_v13 = vld [vmem:[%s5088_s3 + $0x4] ss:$8 sps:$4 sm:$0xff]  }
  0xc4   :  { %1754 = vmatprep.subr.bf16.mxu0 %v3669_v15  ;;  %1918 = vmatprep.subr.bf16.mxu1 %v3672_v16  ;;  %v3759_v15 = vld [vmem:[%s5088_s3] ss:$8 sps:$4 sm:$0xff]   ;;  %v3764_v16 = vld [vmem:[%s5088_s3 + $0x14] ss:$8 sps:$4 sm:$0xff]  }
  0xc5   :  { %1784 = vmatprep.mubr.bf16.mxu0 %v2910_v18  ;;  %1948 = vmatprep.mubr.bf16.mxu1 %v2910_v18  ;;  %v3770_v18 = vld [vmem:[%s5088_s3 + $0x34] ss:$8 sps:$4 sm:$0xff]  }
  0xc7   :  { %1755 = vmatpush1.bf16.msra.mxu0 %v3667_v17  ;;  %1919 = vmatpush1.bf16.msra.mxu1 %v3670_v11  ;;  %v3762_v17 = vld [vmem:[%s5088_s3 + $0x10] ss:$8 sps:$4 sm:$0xff]   ;;  %v3765_v11 = vld [vmem:[%s5088_s3 + $0x20] ss:$8 sps:$4 sm:$0xff]  }
  0xc8   :  { %1756 = vmatprep.subr.bf16.mxu0 %v3675_v19  ;;  %1920 = vmatprep.subr.bf16.mxu1 %v3678_v20  ;;  %v3768_v19 = vld [vmem:[%s5088_s3 + $0x30] ss:$8 sps:$4 sm:$0xff]   ;;  %v3773_v20 = vld [vmem:[%s5088_s3 + $0x44] ss:$8 sps:$4 sm:$0xff]  }
  0xcb   :  { %1757 = vmatpush1.bf16.msra.mxu0 %v3673_v21  ;;  %1921 = vmatpush1.bf16.msra.mxu1 %v3676_v22  ;;  %v3771_v21 = vld [vmem:[%s5088_s3 + $0x40] ss:$8 sps:$4 sm:$0xff]   ;;  %v3776_v22 = vld [vmem:[%s5088_s3 + $0x54] ss:$8 sps:$4 sm:$0xff]  }
  0xcc   :  { %1758 = vmatprep.subr.bf16.mxu0 %v3681_v23  ;;  %1922 = vmatprep.subr.bf16.mxu1 %v3684_v24  ;;  %v3774_v23 = vld [vmem:[%s5088_s3 + $0x50] ss:$8 sps:$4 sm:$0xff]   ;;  %v3779_v24 = vld [vmem:[%s5088_s3 + $0x64] ss:$8 sps:$4 sm:$0xff]  }
  0xcf   :  { %1759 = vmatpush1.bf16.msra.mxu0 %v3679_v25  ;;  %1923 = vmatpush1.bf16.msra.mxu1 %v3682_v26  ;;  %v3777_v25 = vld [vmem:[%s5088_s3 + $0x60] ss:$8 sps:$4 sm:$0xff]   ;;  %v3782_v26 = vld [vmem:[%s5088_s3 + $0x74] ss:$8 sps:$4 sm:$0xff]  }
  0xd0   :  { %1760 = vmatprep.subr.bf16.mxu0 %v3687_v27  ;;  %1924 = vmatprep.subr.bf16.mxu1 %v3690_v28  ;;  %v3780_v27 = vld [vmem:[%s5088_s3 + $0x70] ss:$8 sps:$4 sm:$0xff]   ;;  %v3785_v28 = vld [vmem:[%s5088_s3 + $0x84] ss:$8 sps:$4 sm:$0xff]  }
  0xd3   :  { %1761 = vmatpush1.bf16.msra.mxu0 %v3685_v29  ;;  %1925 = vmatpush1.bf16.msra.mxu1 %v3688_v30  ;;  %v3783_v29 = vld [vmem:[%s5088_s3 + $0x80] ss:$8 sps:$4 sm:$0xff]   ;;  %v3788_v30 = vld [vmem:[%s5088_s3 + $0x94] ss:$8 sps:$4 sm:$0xff]  }
  0xd4   :  { %1762 = vmatprep.subr.bf16.mxu0 %v3693_v31  ;;  %1926 = vmatprep.subr.bf16.mxu1 %v3696_v32  ;;  %v3786_v31 = vld [vmem:[%s5088_s3 + $0x90] ss:$8 sps:$4 sm:$0xff]   ;;  %v3791_v32 = vld [vmem:[%s5088_s3 + $0xa4] ss:$8 sps:$4 sm:$0xff]  }
  0xd7   :  { %1763 = vmatpush1.bf16.msra.mxu0 %v3691_v33  ;;  %1927 = vmatpush1.bf16.msra.mxu1 %v3694_v34  ;;  %v3789_v33 = vld [vmem:[%s5088_s3 + $0xa0] ss:$8 sps:$4 sm:$0xff]   ;;  %v3792_v34 = vld [vmem:[%s5088_s3 + $0xb0] ss:$8 sps:$4 sm:$0xff]  }
  0xd8   :  { %1764 = vmatprep.subr.bf16.mxu0 %v3699_v35  ;;  %1928 = vmatprep.subr.bf16.mxu1 %v3702_v36  ;;  %v3794_v35 = vld [vmem:[%s5088_s3 + $0xb4] ss:$8 sps:$4 sm:$0xff]   ;;  %v3797_v36 = vld [vmem:[%s5088_s3 + $0xc4] ss:$8 sps:$4 sm:$0xff]  }
  0xdb   :  { %1765 = vmatpush1.bf16.msra.mxu0 %v3697_v37  ;;  %1929 = vmatpush1.bf16.msra.mxu1 %v3700_v38  ;;  %v3795_v37 = vld [vmem:[%s5088_s3 + $0xc0] ss:$8 sps:$4 sm:$0xff]   ;;  %v3800_v38 = vld [vmem:[%s5088_s3 + $0xd4] ss:$8 sps:$4 sm:$0xff]  }
  0xdc   :  { %1766 = vmatprep.subr.bf16.mxu0 %v3705_v39  ;;  %1930 = vmatprep.subr.bf16.mxu1 %v3708_v40  ;;  %v3798_v39 = vld [vmem:[%s5088_s3 + $0xd0] ss:$8 sps:$4 sm:$0xff]   ;;  %v3803_v40 = vld [vmem:[%s5088_s3 + $0xe4] ss:$8 sps:$4 sm:$0xff]  }
  0xdf   :  { %1767 = vmatpush1.bf16.msra.mxu0 %v3703_v41  ;;  %1931 = vmatpush1.bf16.msra.mxu1 %v3706_v42  ;;  %v3801_v41 = vld [vmem:[%s5088_s3 + $0xe0] ss:$8 sps:$4 sm:$0xff]   ;;  %v3806_v42 = vld [vmem:[%s5088_s3 + $0xf4] ss:$8 sps:$4 sm:$0xff]  }
  0xe0   :  { %1768 = vmatprep.subr.bf16.mxu0 %v3711_v43  ;;  %1932 = vmatprep.subr.bf16.mxu1 %v3714_v44  ;;  %v3804_v43 = vld [vmem:[%s5088_s3 + $0xf0] ss:$8 sps:$4 sm:$0xff]   ;;  %v3809_v44 = vld [vmem:[%s5088_s3 + $0x104] ss:$8 sps:$4 sm:$0xff]  }
  0xe3   :  { %1769 = vmatpush1.bf16.msra.mxu0 %v3709_v45  ;;  %1933 = vmatpush1.bf16.msra.mxu1 %v3712_v46  ;;  %v301_v45 = vlaneseq }
  0xe4   :  { %1770 = vmatprep.subr.bf16.mxu0 %v3717_v47  ;;  %1934 = vmatprep.subr.bf16.mxu1 %v3720_v48  ;;  %v4869_v48 = vld [vmem:[%s5089_s2] sm:$0xf] }
  0xe5   :  { %v4863_v46 = vshrl.u32 %v301_v45, 7 }
  0xe7   :  { %1771 = vmatpush1.bf16.msra.mxu0 %v3715_v49  ;;  %1935 = vmatpush1.bf16.msra.mxu1 %v3718_v50  ;;  %v303_v47 = vsub.s32 0, %v4863_v46  ;;  %v307_v49 = vsub.s32 1, %v4863_v46  ;;  %v315_v50 = vsub.s32 3, %v4863_v46 }
  0xe8   :  { %1772 = vmatprep.subr.bf16.mxu0 %v3723_v51  ;;  %1936 = vmatprep.subr.bf16.mxu1 %v3726_v52 }
  0xe9   :  { %v304_v51 = vrot.slane %v4869_v48, %v303_v47  ;;  %v308_v52 = vrot.slane %v4869_v48, %v307_v49 }
  0xeb   :  { %1773 = vmatpush1.bf16.msra.mxu0 %v3721_v53  ;;  %1937 = vmatpush1.bf16.msra.mxu1 %v3724_v54  ;;  %v316_v53 = vrot.slane %v4869_v48, %v315_v50 }
  0xec   :  { %1774 = vmatprep.subr.bf16.mxu0 %v3729_v55  ;;  %1938 = vmatprep.subr.bf16.mxu1 %v3732_v56 }
  0xef   :  { %1775 = vmatpush1.bf16.msra.mxu0 %v3727_v57  ;;  %1939 = vmatpush1.bf16.msra.mxu1 %v3730_v58 }
  0xf0   :  { %1776 = vmatprep.subr.bf16.mxu0 %v3735_v59  ;;  %1940 = vmatprep.subr.bf16.mxu1 %v3738_v60 }
  0xf3   :  { %1777 = vmatpush1.bf16.msra.mxu0 %v3733_v61  ;;  %1941 = vmatpush1.bf16.msra.mxu1 %v3736_v62 }
  0xf4   :  { %1778 = vmatprep.subr.bf16.mxu0 %v3741_v63  ;;  %1942 = vmatprep.subr.bf16.mxu1 %v3744_v0 }
  0xf7   :  { %1779 = vmatpush1.bf16.msra.mxu0 %v3739_v1  ;;  %1943 = vmatpush1.bf16.msra.mxu1 %v3742_v2 }
  0xf8   :  { %1780 = vmatprep.subr.bf16.mxu0 %v3747_v3  ;;  %1944 = vmatprep.subr.bf16.mxu1 %v3750_v4 }
  0xfb   :  { %1781 = vmatpush1.bf16.msra.mxu0 %v3745_v5  ;;  %1945 = vmatpush1.bf16.msra.mxu1 %v3748_v6 }
  0xfc   :  { %1782 = vmatprep.subr.bf16.mxu0 %v3753_v7  ;;  %1946 = vmatprep.subr.bf16.mxu1 %v3756_v8 }
  0xff   :  { %1783 = vmatpush1.bf16.msra.mxu0 %v3751_v9  ;;  %1947 = vmatpush1.bf16.msra.mxu1 %v3754_v12 }
 0x100   :  { %2393 = vmatprep.subr.bf16.mxu0 %v3761_v13 }
 0x102   :  { %1785 = vmatmul.mubr.bf16.vlgmr.msra.gmra.mrb[0].mxu0 %v2909_v14  ;;  %1949 = vmatmul.mubr.bf16.vlgmr.msra.gmra.mrb[0].mxu1 %v2909_v14 }
 0x103   :  { %2394 = vmatpush1.bf16.msra.mxu0 %v3759_v15 }
 0x104   :  { %2395 = vmatprep.subr.bf16.mxu0 %v3764_v16 }
 0x107   :  { %2396 = vmatpush1.bf16.msra.mxu0 %v3762_v17 }
 0x108   :  { %2397 = vmatprep.subr.bf16.mxu0 %v3767_v10 }
 0x10b   :  { %2398 = vmatpush1.bf16.msra.mxu0 %v3765_v11 }
 0x10c   :  { %2399 = vmatprep.subr.bf16.mxu0 %v3770_v18 }
 0x10f   :  { %2400 = vmatpush1.bf16.msra.mxu0 %v3768_v19 }
 0x110   :  { %2401 = vmatprep.subr.bf16.mxu0 %v3773_v20 }
 0x113   :  { %2402 = vmatpush1.bf16.msra.mxu0 %v3771_v21 }
 0x114   :  { %2403 = vmatprep.subr.bf16.mxu0 %v3776_v22 }
 0x117   :  { %2404 = vmatpush1.bf16.msra.mxu0 %v3774_v23 }
 0x118   :  { %2405 = vmatprep.subr.bf16.mxu0 %v3779_v24 }
 0x11b   :  { %2406 = vmatpush1.bf16.msra.mxu0 %v3777_v25 }
 0x11c   :  { %2407 = vmatprep.subr.bf16.mxu0 %v3782_v26 }
 0x11f   :  { %2408 = vmatpush1.bf16.msra.mxu0 %v3780_v27 }
 0x120   :  { %2409 = vmatprep.subr.bf16.mxu0 %v3785_v28 }
 0x123   :  { %2410 = vmatpush1.bf16.msra.mxu0 %v3783_v29  ;;  %v3807_v29 = vld [vmem:[%s5088_s3 + $0x100] ss:$8 sps:$4 sm:$0xff]  }
 0x124   :  { %2411 = vmatprep.subr.bf16.mxu0 %v3788_v30 }
 0x127   :  { %2412 = vmatpush1.bf16.msra.mxu0 %v3786_v31  ;;  %v3812_v31 = vld [vmem:[%s5088_s3 + $0x114] ss:$8 sps:$4 sm:$0xff]  }
 0x128   :  { %2413 = vmatprep.subr.bf16.mxu0 %v3791_v32 }
 0x12b   :  { %2414 = vmatpush1.bf16.msra.mxu0 %v3789_v33  ;;  %v3810_v33 = vld [vmem:[%s5088_s3 + $0x110] ss:$8 sps:$4 sm:$0xff]  }
 0x12c   :  { %2415 = vmatprep.subr.bf16.mxu0 %v3794_v35  ;;  %v3813_v35 = vld [vmem:[%s5088_s3 + $0x120] ss:$8 sps:$4 sm:$0xff]  }
 0x12f   :  { %2416 = vmatpush1.bf16.msra.mxu0 %v3792_v34  ;;  %v3815_v34 = vld [vmem:[%s5088_s3 + $0x124] ss:$8 sps:$4 sm:$0xff]  }
 0x130   :  { %2417 = vmatprep.subr.bf16.mxu0 %v3797_v36  ;;  %v3818_v36 = vld [vmem:[%s5088_s3 + $0x134] ss:$8 sps:$4 sm:$0xff]  }
 0x133   :  { %2418 = vmatpush1.bf16.msra.mxu0 %v3795_v37  ;;  %v311_v37 = vsub.s32 2, %v4863_v46 }
 0x134   :  { %2419 = vmatprep.subr.bf16.mxu0 %v3800_v38  ;;  %v3816_v38 = vld [vmem:[%s5088_s3 + $0x130] ss:$8 sps:$4 sm:$0xff]  }
 0x137   :  { %2420 = vmatpush1.bf16.msra.mxu0 %v3798_v39  ;;  %v3821_v39 = vld [vmem:[%s5088_s3 + $0x144] ss:$8 sps:$4 sm:$0xff]  }
 0x138   :  { %2421 = vmatprep.subr.bf16.mxu0 %v3803_v40  ;;  %v312_v40 = vrot.slane %v4869_v48, %v311_v37  ;;  %v3827_v48 = vld [vmem:[%s5088_s3 + $0x164] ss:$8 sps:$4 sm:$0xff]  }
 0x13b   :  { %2422 = vmatpush1.bf16.msra.mxu0 %v3801_v41  ;;  %v3819_v41 = vld [vmem:[%s5088_s3 + $0x140] ss:$8 sps:$4 sm:$0xff]  }
 0x13c   :  { %2423 = vmatprep.subr.bf16.mxu0 %v3806_v42  ;;  %v3824_v42 = vld [vmem:[%s5088_s3 + $0x154] ss:$8 sps:$4 sm:$0xff]  }
 0x13f   :  { %2424 = vmatpush1.bf16.msra.mxu0 %v3804_v43 }
 0x140   :  { %2434 = vmatprep.subr.bf16.mxu0 %v3809_v44  ;;  %v3822_v44 = vld [vmem:[%s5088_s3 + $0x150] ss:$8 sps:$4 sm:$0xff]  }
 0x1d5   :  { %v1786_v54 = vpop.f32.mrb[0].mxu0  ;;  %v4880_v55 = vpop.f32.mrb[0].mxu1 }
 0x1d6   :  { %v3331_v56 = vadd.f32 %v1786_v54, %v304_v51  ;;  %v1788_v57 = vpop.f32.mrb[1].mxu0  ;;  %v1952_v58 = vpop.f32.mrb[1].mxu1  ;;  %v3333_v43 = vadd.f32 %v4880_v55, %v312_v40  ;;  %v3825_v51 = vld [vmem:[%s5088_s3 + $0x160] ss:$8 sps:$4 sm:$0xff]   ;;  %v3828_v54 = vld [vmem:[%s5088_s3 + $0x170] ss:$8 sps:$4 sm:$0xff]  }
 0x1d7   :  { %v3332_v59 = vadd.f32 %v1788_v57, %v308_v52  ;;  %v3334_v60 = vadd.f32 %v1952_v58, %v316_v53  ;;  %v1790_v61 = vpop.f32.mrb[2].mxu0  ;;  %v1954_v62 = vpop.f32.mrb[2].mxu1  ;;  %v3830_v52 = vld [vmem:[%s5088_s3 + $0x174] ss:$8 sps:$4 sm:$0xff]   ;;  %v3833_v55 = vld [vmem:[%s5088_s3 + $0x184] ss:$8 sps:$4 sm:$0xff]  }
 0x1d8   :  { %v1961_v63 = vmul.f32 0.044715, %v3331_v56  ;;  %v1791_v0 = vpop.f32.mrb[3].mxu0  ;;  %v1955_v1 = vpop.f32.mrb[3].mxu1  ;;  %v1957_v18 = vmul.f32 0.5, %v3331_v56 }
 0x1d9   :  { %v1962_v2 = vmul.f32 0.044715, %v3332_v59  ;;  %v1964_v3 = vmul.f32 0.044715, %v3334_v60  ;;  %v1958_v21 = vmul.f32 0.5, %v3332_v59  ;;  %v1960_v24 = vmul.f32 0.5, %v3334_v60 }
 0x1da   :  { %v1965_v4 = vmul.f32 %v3331_v56, %v1961_v63  ;;  %v1963_v50 = vmul.f32 0.044715, %v3333_v43  ;;  %v3831_v57 = vld [vmem:[%s5088_s3 + $0x180] ss:$8 sps:$4 sm:$0xff]   ;;  %v3836_v58 = vld [vmem:[%s5088_s3 + $0x194] ss:$8 sps:$4 sm:$0xff]  }
 0x1db   :  { %v1966_v5 = vmul.f32 %v3332_v59, %v1962_v2  ;;  %v1968_v6 = vmul.f32 %v3334_v60, %v1964_v3  ;;  %v3839_v61 = vld [vmem:[%s5088_s3 + $0x1a4] ss:$8 sps:$4 sm:$0xff]   ;;  %v3837_v62 = vld [vmem:[%s5088_s3 + $0x1a0] ss:$8 sps:$4 sm:$0xff]   ;;  %v3842_v0 = vld [vmem:[%s5088_s3 + $0x1b4] ss:$8 sps:$4 sm:$0xff]  }
 0x1dc   :  { %v1969_v7 = vmul.f32 %v3331_v56, %v1965_v4  ;;  %v1967_v53 = vmul.f32 %v3333_v43, %v1963_v50  ;;  %v3840_v1 = vld [vmem:[%s5088_s3 + $0x1b0] ss:$8 sps:$4 sm:$0xff]   ;;  %v3845_v2 = vld [vmem:[%s5088_s3 + $0x1c4] ss:$8 sps:$4 sm:$0xff]   ;;  %v3843_v3 = vld [vmem:[%s5088_s3 + $0x1c0] ss:$8 sps:$4 sm:$0xff]  }
 0x1dd   :  { %v1970_v8 = vmul.f32 %v3332_v59, %v1966_v5  ;;  %v1972_v9 = vmul.f32 %v3334_v60, %v1968_v6  ;;  %v3848_v4 = vld [vmem:[%s5088_s3 + $0x1d4] ss:$8 sps:$4 sm:$0xff]   ;;  %v3846_v5 = vld [vmem:[%s5088_s3 + $0x1d0] ss:$8 sps:$4 sm:$0xff]   ;;  %v3851_v6 = vld [vmem:[%s5088_s3 + $0x1e4] ss:$8 sps:$4 sm:$0xff]  }
 0x1de   :  { %v1973_v12 = vadd.f32 %v3331_v56, %v1969_v7  ;;  %v1971_v56 = vmul.f32 %v3333_v43, %v1967_v53 }
 0x1df   :  { %v1974_v13 = vadd.f32 %v3332_v59, %v1970_v8  ;;  %v1976_v14 = vadd.f32 %v3334_v60, %v1972_v9  ;;  %v3834_v60 = vld [vmem:[%s5088_s3 + $0x190] ss:$8 sps:$4 sm:$0xff]   ;;  %v3849_v8 = vld [vmem:[%s5088_s3 + $0x1e0] ss:$8 sps:$4 sm:$0xff]   ;;  %v3854_v9 = vld [vmem:[%s5088_s3 + $0x1f4] ss:$8 sps:$4 sm:$0xff]  }
 0x1e0   :  { %v1977_v15 = vmul.f32 0.7978846, %v1973_v12  ;;  %v1975_v59 = vadd.f32 %v3333_v43, %v1971_v56 }
 0x1e1   :  { %v1978_v16 = vmul.f32 0.7978846, %v1974_v13  ;;  %v1980_v17 = vmul.f32 0.7978846, %v1976_v14  ;;  %v1959_v13 = vmul.f32 0.5, %v3333_v43 }
 0x1e2   :  { %3883 = vtanh.f32 %v1977_v15  ;;  %v1979_v63 = vmul.f32 0.7978846, %v1975_v59  ;;  %v3852_v14 = vld [vmem:[%s5088_s3 + $0x1f0] ss:$8 sps:$4 sm:$0xff]  }
 0x1e3   :  { %3885 = vtanh.f32 %v1978_v16 }
 0x1e4   :  { %3887 = vtanh.f32 %v1980_v17  ;;  %v3855_v17 = vld [vmem:[%s5090_s5 + $0x40] sm:$0xff]  }
 0x1e5   :  { %3889 = vtanh.f32 %v1979_v63  ;;  %3263 = vmatprep.subr.bf16.mxu1 %v3855_v17  ;;  %v3872_v63 = vld [vmem:[%s5092_s7 + $0x8] sm:$0xff]  }
 0x1ec   :  { %v3884_v10 = vpop.eup %3883 }
 0x1ed   :  { %v3886_v11 = vpop.eup %3885  ;;  %v1985_v19 = vadd.f32 1.0, %v3884_v10  ;;  %v3856_v10 = vld [vmem:[%s5090_s5] sm:$0xff]  }
 0x1ee   :  { %v3888_v20 = vpop.eup %3887  ;;  %v1986_v22 = vadd.f32 1.0, %v3886_v11  ;;  %3264 = vmatpush3.bf16.msra.mxu1 %v3856_v10  ;;  %v3857_v11 = vld [vmem:[%s5090_s5 + $0x48] sm:$0xff]  }
 0x1ef   :  { %v1989_v23 = vmul.f32 %v1985_v19, %v1957_v18  ;;  %v1988_v25 = vadd.f32 1.0, %v3888_v20  ;;  %v3890_v7 = vpop.eup %3889  ;;  %v3858_v18 = vld [vmem:[%s5090_s5 + $0x8] sm:$0xff]   ;;  %3265 = vmatprep.subr.bf16.mxu1 %v3857_v11  ;;  %v3859_v19 = vld [vmem:[%s5090_s5 + $0x50] sm:$0xff]  }
 0x1f0   :  { %v1990_v26 = vmul.f32 %v1986_v22, %v1958_v21  ;;  %v1987_v12 = vadd.f32 1.0, %v3890_v7  ;;  %v3860_v20 = vld [vmem:[%s5090_s5 + $0x10] sm:$0xff]   ;;  %v3861_v21 = vld [vmem:[%s5090_s5 + $0x58] sm:$0xff]   ;;  %v3231_v7 = vld [vmem:[%s5093_s6] ss:$0 sm:$0xff] }
 0x1f1   :  { %v1992_v27 = vmul.f32 %v1988_v25, %v1960_v24  ;;  %v1993_v30 = vpack.c.bf16 %v1989_v23, %v1989_v23  ;;  %v3862_v22 = vld [vmem:[%s5090_s5 + $0x18] sm:$0xff]   ;;  %v3863_v23 = vld [vmem:[%s5090_s5 + $0x60] sm:$0xff]   ;;  %v3865_v25 = vld [vmem:[%s5090_s5 + $0x68] sm:$0xff]  }
 0x1f2   :  { %v1994_v28 = vpack.c.bf16 %v1990_v26, %v1990_v26  ;;  %v1991_v15 = vmul.f32 %v1987_v12, %v1959_v13  ;;  %3266 = vmatpush3.bf16.msra.mxu1 %v3858_v18  ;;  %v3864_v24 = vld [vmem:[%s5090_s5 + $0x20] sm:$0xff]   ;;  %v3866_v26 = vld [vmem:[%s5090_s5 + $0x28] sm:$0xff]  }
 0x1f3   :  { %v1996_v32 = vpack.c.bf16 %v1992_v27, %v1992_v27  ;;  %3267 = vmatprep.subr.bf16.mxu1 %v3859_v19  ;;  %v3867_v27 = vld [vmem:[%s5090_s5 + $0x70] sm:$0xff]  }
 0x1f4   :  { %2425 = vmatprep.mubr.bf16.mxu0 %v1994_v28  ;;  %v1995_v16 = vpack.c.bf16 %v1991_v15, %v1991_v15  ;;  %v3868_v28 = vld [vmem:[%s5090_s5 + $0x30] sm:$0xff]  }
 0x1f5   :  { %2426 = vmatmul.mubr.bf16.vlgmr.msra.gmra.mrb[4].mxu0 %v1993_v30  ;;  %v3870_v30 = vld [vmem:[%s5090_s5 + $0x38] sm:$0xff]  }
 0x1f6   :  { %2435 = vmatpush1.bf16.msra.mxu0 %v3807_v29  ;;  %2466 = vmatprep.mubr.bf16.mxu0 %v1996_v32  ;;  %v3869_v29 = vld [vmem:[%s5090_s5 + $0x78] sm:$0xff]  }
 0x1f7   :  { %2436 = vmatprep.subr.bf16.mxu0 %v3812_v31  ;;  %3268 = vmatpush3.bf16.msra.mxu1 %v3860_v20  ;;  %v2061_v31 = vld [vmem:[%s5091_s4] sm:$0x3] }
 0x1f8   :  { %3269 = vmatprep.subr.bf16.mxu1 %v3861_v21  ;;  %v2066_v32 = vrot.slane %v2061_v31, %v303_v47 }
 0x1fa   :  { %2437 = vmatpush1.bf16.msra.mxu0 %v3810_v33  ;;  %v2070_v33 = vrot.slane %v2061_v31, %v307_v49 }
 0x1fb   :  { %2438 = vmatprep.subr.bf16.mxu0 %v3815_v34  ;;  %3270 = vmatpush3.bf16.msra.mxu1 %v3862_v22 }
 0x1fc   :  { %3271 = vmatprep.subr.bf16.mxu1 %v3863_v23  ;;  %v3879_v23 = vld [vmem:[%s5094_s9] sm:$0xff]  }
 0x1fe   :  { %2439 = vmatpush1.bf16.msra.mxu0 %v3813_v35 }
 0x1ff   :  { %2440 = vmatprep.subr.bf16.mxu0 %v3818_v36  ;;  %3272 = vmatpush3.bf16.msra.mxu1 %v3864_v24  ;;  %v3880_v24 = vld [vmem:[%s5094_s9 + $0x8] sm:$0xff]  }
 0x200   :  { %3273 = vmatprep.subr.bf16.mxu1 %v3865_v25  ;;  %v3881_v25 = vld [vmem:[%s5094_s9 + $0x10] sm:$0xff]  }
 0x202   :  { %2441 = vmatpush1.bf16.msra.mxu0 %v3816_v38 }
 0x203   :  { %2442 = vmatprep.subr.bf16.mxu0 %v3821_v39  ;;  %3274 = vmatpush3.bf16.msra.mxu1 %v3866_v26  ;;  %v3882_v26 = vld [vmem:[%s5094_s9 + $0x18] sm:$0xff]  }
 0x204   :  { %3275 = vmatprep.subr.bf16.mxu1 %v3867_v27  ;;  %v3248_v27 = vld [vmem:[%s5095_s8] ss:$0 sm:$0xff] }
 0x206   :  { %2443 = vmatpush1.bf16.msra.mxu0 %v3819_v41 }
 0x207   :  { %2444 = vmatprep.subr.bf16.mxu0 %v3824_v42  ;;  %3276 = vmatpush3.bf16.msra.mxu1 %v3868_v28 }
 0x208   :  { %3277 = vmatprep.subr.bf16.mxu1 %v3869_v29 }
 0x20a   :  { %2445 = vmatpush1.bf16.msra.mxu0 %v3822_v44 }
 0x20b   :  { %2446 = vmatprep.subr.bf16.mxu0 %v3827_v48  ;;  %3278 = vmatpush3.bf16.msra.mxu1 %v3870_v30 }
 0x20e   :  { %2447 = vmatpush1.bf16.msra.mxu0 %v3825_v51 }
 0x20f   :  { %2448 = vmatprep.subr.bf16.mxu0 %v3830_v52 }
 0x212   :  { %2449 = vmatpush1.bf16.msra.mxu0 %v3828_v54 }
 0x213   :  { %2450 = vmatprep.subr.bf16.mxu0 %v3833_v55 }
 0x216   :  { %2451 = vmatpush1.bf16.msra.mxu0 %v3831_v57 }
 0x217   :  { %2452 = vmatprep.subr.bf16.mxu0 %v3836_v58 }
 0x21a   :  { %2453 = vmatpush1.bf16.msra.mxu0 %v3834_v60 }
 0x21b   :  { %2454 = vmatprep.subr.bf16.mxu0 %v3839_v61  ;;  %v3871_v61 = vld [vmem:[%s5092_s7] sm:$0xff]  }
 0x21e   :  { %2455 = vmatpush1.bf16.msra.mxu0 %v3837_v62  ;;  %v3903_v62 = vmov 0.0  }
 0x21f   :  { %2456 = vmatprep.subr.bf16.mxu0 %v3842_v0  ;;  %3299 = vmatprep.subr.bf16.mxu1 %v3903_v62  ;;  %v3873_v0 = vld [vmem:[%s5092_s7 + $0x10] sm:$0xff]  }
 0x222   :  { %2457 = vmatpush1.bf16.msra.mxu0 %v3840_v1  ;;  %v3874_v1 = vld [vmem:[%s5092_s7 + $0x18] sm:$0xff]  }
 0x223   :  { %2458 = vmatprep.subr.bf16.mxu0 %v3845_v2  ;;  %v3875_v2 = vld [vmem:[%s5092_s7 + $0x20] sm:$0xff]  }
 0x226   :  { %2459 = vmatpush1.bf16.msra.mxu0 %v3843_v3  ;;  %v3876_v3 = vld [vmem:[%s5092_s7 + $0x28] sm:$0xff]  }
 0x227   :  { %2460 = vmatprep.subr.bf16.mxu0 %v3848_v4  ;;  %v3877_v4 = vld [vmem:[%s5092_s7 + $0x30] sm:$0xff]  }
 0x22a   :  { %2461 = vmatpush1.bf16.msra.mxu0 %v3846_v5  ;;  %v3878_v5 = vld [vmem:[%s5092_s7 + $0x38] sm:$0xff]  }
 0x22b   :  { %2462 = vmatprep.subr.bf16.mxu0 %v3851_v6 }
 0x22e   :  { %2463 = vmatpush1.bf16.msra.mxu0 %v3849_v8 }
 0x22f   :  { %2464 = vmatprep.subr.bf16.mxu0 %v3854_v9 }
 0x232   :  { %2465 = vmatpush1.bf16.msra.mxu0 %v3852_v14 }
 0x235   :  { %2467 = vmatmul.mubr.bf16.vlgmr.msra.gmra.mrb[4].mxu0 %v1995_v16 }
 0x308   :  { %v2468_v34 = vpop.f32.mrb[4].mxu0 }
 0x309   :  { %v3335_v35 = vadd.f32 %v2468_v34, %v2066_v32  ;;  %v2470_v36 = vpop.f32.mrb[5].mxu0 }
 0x30a   :  { %v3336_v37 = vadd.f32 %v2470_v36, %v2070_v33  ;;  %v2472_v38 = vpop.f32.mrb[6].mxu0 }
 0x30b   :  { %v2477_v39 = vmul.f32 0.044715, %v3335_v35  ;;  %v2473_v40 = vpop.f32.mrb[7].mxu0  ;;  %v2475_v49 = vmul.f32 0.5, %v3335_v35 }
 0x30c   :  { %v2478_v41 = vmul.f32 0.044715, %v3336_v37  ;;  %v2476_v55 = vmul.f32 0.5, %v3336_v37 }
 0x30d   :  { %v2479_v42 = vmul.f32 %v3335_v35, %v2477_v39 }
 0x30e   :  { %v2480_v43 = vmul.f32 %v3336_v37, %v2478_v41 }
 0x30f   :  { %v2481_v44 = vmul.f32 %v3335_v35, %v2479_v42 }
 0x310   :  { %v2482_v48 = vmul.f32 %v3336_v37, %v2480_v43  ;;  %v2885_v43 = vand.u32 127, %v301_v45 }
 0x311   :  { %v2483_v50 = vadd.f32 %v3335_v35, %v2481_v44  ;;  %v3257_v44 = vld [vmem:[%s5096_s10] ss:$0 sm:$0xff] }
 0x312   :  { %v2484_v51 = vadd.f32 %v3336_v37, %v2482_v48  ;;  %vm2886_vm2 = vcmp.lt.s32.totalorder %v2885_v43, 5 }
 0x313   :  { %v2485_v52 = vmul.f32 0.7978846, %v2483_v50 }
 0x314   :  { %v2486_v53 = vmul.f32 0.7978846, %v2484_v51 }
 0x315   :  { %3891 = vtanh.f32 %v2485_v52 }
 0x316   :  { %3893 = vtanh.f32 %v2486_v53 }
 0x31f   :  { %v3892_v46 = vpop.eup %3891 }
 0x320   :  { %v3894_v47 = vpop.eup %3893  ;;  %v2489_v54 = vadd.f32 1.0, %v3892_v46 }
 0x321   :  { %v2490_v56 = vadd.f32 1.0, %v3894_v47 }
 0x322   :  { %v2491_v57 = vmul.f32 %v2489_v54, %v2475_v49 }
 0x323   :  { %v2492_v58 = vmul.f32 %v2490_v56, %v2476_v55 }
 0x324   :  { %v2493_v60 = vpack.c.bf16 %v2491_v57, %v2491_v57 }
 0x325   :  { %v2494_v59 = vpack.c.bf16 %v2492_v58, %v2492_v58 }
 0x327   :  { %2662 = vmatprep.mubr.bf16.mxu1 %v2494_v59 }
 0x328   :  { %2663 = vmatmul.mubr.bf16.vlgmr.msra.gmra.mrb[4].mxu1 %v2493_v60 }
 0x329   :  { %3300 = vmatpush3.bf16.msra.mxu1 %v3871_v61  ;;  %3315 = vmatprep.mubr.msk.bf16.mxu1 %vm3904_vm0, %v3903_v62 }
 0x32a   :  { %3301 = vmatprep.subr.bf16.mxu1 %v3903_v62 }
 0x32d   :  { %3302 = vmatpush3.bf16.msra.mxu1 %v3872_v63 }
 0x32e   :  { %3303 = vmatprep.subr.bf16.mxu1 %v3903_v62 }
 0x331   :  { %3304 = vmatpush3.bf16.msra.mxu1 %v3873_v0 }
 0x332   :  { %3305 = vmatprep.subr.bf16.mxu1 %v3903_v62 }
 0x335   :  { %3306 = vmatpush3.bf16.msra.mxu1 %v3874_v1 }
 0x336   :  { %3307 = vmatprep.subr.bf16.mxu1 %v3903_v62 }
 0x339   :  { %3308 = vmatpush3.bf16.msra.mxu1 %v3875_v2 }
 0x33a   :  { %3309 = vmatprep.subr.bf16.mxu1 %v3903_v62 }
 0x33d   :  { %3310 = vmatpush3.bf16.msra.mxu1 %v3876_v3 }
 0x33e   :  { %3311 = vmatprep.subr.bf16.mxu1 %v3903_v62 }
 0x341   :  { %3312 = vmatpush3.bf16.msra.mxu1 %v3877_v4 }
 0x342   :  { %3313 = vmatprep.subr.bf16.mxu1 %v3903_v62 }
 0x345   :  { %3314 = vmatpush3.bf16.msra.mxu1 %v3878_v5 }
 0x346   :  { %3319 = vmatprep.subr.bf16.mxu1 %v3903_v62 }
 0x3fb   :  { %v3279_v6 = vpop.f32.mrb[4].mxu1 }
 0x3fc   :  { %v3280_v8 = vpop.f32.mrb[5].mxu1 }
 0x3fd   :  { %v3281_v9 = vadd.f32 %v3280_v8, %v3279_v6  ;;  %v3282_v12 = vpop.f32.mrb[6].mxu1 }
 0x3fe   :  { %v3283_v13 = vpop.f32.mrb[7].mxu1 }
 0x3ff   :  { %v2665_v14 = vadd.f32 %v3281_v9, %v3231_v7 }
 0x401   :  { %v2671_v15 = vmul.f32 0.044715, %v2665_v14  ;;  %v2670_v19 = vmul.f32 0.5, %v2665_v14 }
 0x403   :  { %v2672_v16 = vmul.f32 %v2671_v15, %v2665_v14 }
 0x405   :  { %v2673_v17 = vmul.f32 %v2672_v16, %v2665_v14 }
 0x407   :  { %v2674_v10 = vadd.f32 %v2673_v17, %v2665_v14 }
 0x409   :  { %v2675_v11 = vmul.f32 0.7978846, %v2674_v10 }
 0x40b   :  { %3895 = vtanh.f32 %v2675_v11 }
 0x415   :  { %v3896_v18 = vpop.eup %3895 }
 0x416   :  { %v2677_v20 = vadd.f32 1.0, %v3896_v18 }
 0x418   :  { %v2678_v21 = vmul.f32 %v2677_v20, %v2670_v19 }
 0x41a   :  { %v2679_v22 = vpack.c.bf16 %v2678_v21, %v2678_v21 }
 0x41c   :  { %3316 = vmatmul.mubr.bf16.vlgmr.msra.gmra.mrb[8].mxu1 %v2679_v22 }
 0x41d   :  { %3327 = vmatprep.mubr.msk.bf16.mxu1 %vm3904_vm0, %v3903_v62  ;;  %3320 = vmatpush3.bf16.msra.mxu1 %v3879_v23 }
 0x41e   :  { %3321 = vmatprep.subr.bf16.mxu1 %v3903_v62 }
 0x421   :  { %3322 = vmatpush3.bf16.msra.mxu1 %v3880_v24 }
 0x422   :  { %3323 = vmatprep.subr.bf16.mxu1 %v3903_v62 }
 0x425   :  { %3324 = vmatpush3.bf16.msra.mxu1 %v3881_v25 }
 0x426   :  { %3325 = vmatprep.subr.bf16.mxu1 %v3903_v62 }
 0x429   :  { %3326 = vmatpush3.bf16.msra.mxu1 %v3882_v26 }
 0x4ef   :  { %v2785_v28 = vpop.f32.mrb[8].mxu1 }
 0x4f0   :  { %v2786_v29 = vadd.f32 %v3248_v27, %v2785_v28  ;;  %v3317_v30 = vpop.f32.mrb[9].mxu1 }
 0x4f1   :  { %v2788_v31 = vpop.f32.mrb[10].mxu1 }
 0x4f2   :  { %v2792_v32 = vmul.f32 0.044715, %v2786_v29  ;;  %v3318_v33 = vpop.f32.mrb[11].mxu1  ;;  %v2791_v39 = vmul.f32 0.5, %v2786_v29 }
 0x4f4   :  { %v2793_v34 = vmul.f32 %v2792_v32, %v2786_v29 }
 0x4f6   :  { %v2794_v35 = vmul.f32 %v2793_v34, %v2786_v29 }
 0x4f8   :  { %v2795_v36 = vadd.f32 %v2794_v35, %v2786_v29 }
 0x4fa   :  { %v2796_v37 = vmul.f32 0.7978846, %v2795_v36 }
 0x4fc   :  { %3897 = vtanh.f32 %v2796_v37 }
 0x506   :  { %v3898_v38 = vpop.eup %3897 }
 0x507   :  { %v2798_v40 = vadd.f32 1.0, %v3898_v38 }
 0x509   :  { %v2799_v41 = vmul.f32 %v2798_v40, %v2791_v39 }
 0x50b   :  { %v2800_v42 = vpack.c.bf16 %v2799_v41, %v2799_v41 }
 0x50d   :  { %3328 = vmatmul.mubr.msk.bf16.vlgmr.msra.gmra.mrb[12].mxu1 %vm2840_vm1, %v2800_v42 }
 0x5e0   :  { %v2878_v48 = vpop.f32.mrb[12].mxu1 }
 0x5e1   :  { %v2879_v50 = vadd.f32 %v3257_v44, %v2878_v48  ;;  %v3329_v51 = vpop.f32.mrb[13].mxu1 }
 0x5e2   :  { %v2881_v52 = vpop.f32.mrb[14].mxu1 }
 0x5e3   :  { %v3330_v53 = vpop.f32.mrb[15].mxu1  ;;  %v2887_v46 = vsel %vm2886_vm2, %v2879_v50, -1e+30 }
 0x5e4   :  { %2888 = vmax.xlane.f32.xlu0 %v2887_v46 }
 0x671   :  { %v2889_v47 = vpop.xlane.xlu0 %2888 }
 0x672   :  { %v2890_v49 = vsub.f32 %v2887_v46, %v2889_v47 }
 0x674   :  { %v2891_v54 = vmul.f32 1.442695, %v2890_v49 }
 0x676   :  { %3899 = vpow2.f32 %v2891_v54 }
 0x680   :  { %v3900_v55 = vpop.eup %3899 }
 0x681   :  { %2893 = vadd.xlane.f32.xlu0 %v3900_v55 }
 0x70e   :  { %v2894_v45 = vpop.xlane.xlu0 %2893 }
 0x70f   :  { %3901 = vrcp.f32 %v2894_v45 }
 0x719   :  { %v3902_v56 = vpop.eup %3901 }
 0x71a   :  { %v2896_v57 = vmul.f32 %v3902_v56, %v3900_v55 }
 0x71c   :  { %v2897_v58 = vsel %vm2886_vm2, %v2896_v57, %v2879_v50 }
 0x71d   :  { %2898 = vst [vmem:[%s5097_s11] sm:$0xff] %v2897_v58 }

</bundles_post_ra>
